<compile_context>
chip_gen: v6e
topology: v6e:2x2x1
jax: 0.10.0
libtpu: 0.0.40
codegen_flags: <defaults>
</compile_context>

<pallas_src>
import functools

import jax
import jax.numpy as jnp
from jax import lax
from jax.experimental import pallas as pl
from jax.experimental.pallas import tpu as pltpu


# -----------------------------------------------------------------------------
# Fused kernel: 3x3 conv (pad=1) + bias + ReLU + 1x1 conv + bias, one image per
# grid step.  All tensors in-kernel are (channels, H*W)  (pixels in lanes).
# -----------------------------------------------------------------------------
def fused_backbone_decoder_kernel(x_ref, wbb_ref, bbb_ref, wdec_ref, bdec_ref,
                                  o_ref, *, H, W):
    # x_ref:    (1, Cin,  H*W)
    # wbb_ref:  (Cmid, 9*Cin)   -- [co, tap*Cin + cin], tap = kh*3 + kw
    # bbb_ref:  (Cmid, 1)
    # wdec_ref: (Cout, Cmid)
    # bdec_ref: (Cout, 1)
    # o_ref:    (1, Cout, H*W)
    Cin = x_ref.shape[1]
    Cmid = wbb_ref.shape[0]
    Cout = wdec_ref.shape[0]
    HW = H * W

    x = x_ref[0].astype(jnp.float32)                      # (Cin, HW)

    # Zero halo handled entirely in VMEM.  A tap offset (dh, dw) in image
    # coordinates is the single flat offset dh*W + dw, so every shifted view
    # is one static lane-slice of this padded flat buffer.
    zpad = jnp.zeros((Cin, W + 1), jnp.float32)
    xp = jnp.concatenate([zpad, x, zpad], axis=1)         # (Cin, HW + 2W + 2)

    # Horizontal-boundary lane masks (vertical boundary is covered by zpad).
    w_idx = lax.broadcasted_iota(jnp.int32, (1, HW), 1) % W
    mask_l = w_idx >= 1            # lanes where w-1 is in range (dw = -1)
    mask_r = w_idx <= W - 2        # lanes where w+1 is in range (dw = +1)

    wbb = wbb_ref[...]             # (Cmid, 9*Cin)
    wdec = wdec_ref[...]           # (Cout, Cmid)

    # Accumulator initialized to the broadcast bias (no separate bias add).
    acc = jnp.broadcast_to(bbb_ref[...], (Cmid, HW))      # (Cmid, HW)

    # 3x3 taps as VPU broadcast-FMAs over (Cmid, HW) tiles.
    tap = 0
    for dh in (-1, 0, 1):
        for dw in (-1, 0, 1):
            base = (W + 1) + dh * W + dw                  # static offset
            shifted = xp[:, base:base + HW]               # (Cin, HW)
            if dw == -1:
                shifted = jnp.where(mask_l, shifted, 0.0)
            elif dw == 1:
                shifted = jnp.where(mask_r, shifted, 0.0)
            for cin in range(Cin):
                k = tap * Cin + cin
                acc = acc + wbb[:, k:k + 1] * shifted[cin:cin + 1, :]
            tap += 1

    feat = jnp.maximum(acc, 0.0)                          # ReLU, (Cmid, HW)

    # Fused decoder: 1x1 conv == per-pixel linear head, again VPU FMAs.
    out = jnp.broadcast_to(bdec_ref[...], (Cout, HW))     # (Cout, HW)
    for cm in range(Cmid):
        out = out + wdec[:, cm:cm + 1] * feat[cm:cm + 1, :]

    o_ref[...] = out[None].astype(o_ref.dtype)            # lane-dense store


# -----------------------------------------------------------------------------
# Wrapper: NCHW in, NCHW out.  Only free reshapes outside the kernel.
# -----------------------------------------------------------------------------
def basic_model_forward(x_nchw, params):
    """x_nchw: (B, Cin, H, W) f32 -> (B, Cout, H, W) f32."""
    B, Cin, H, W = x_nchw.shape
    HW = H * W
    bb_w, bb_b = params["bb_w"], params["bb_b"]       # (3,3,Cin,Cmid), (Cmid,)
    dec_w, dec_b = params["dec_w"], params["dec_b"]   # (Cmid,Cout),   (Cout,)
    Cmid = bb_w.shape[-1]
    Cout = dec_w.shape[-1]

    # One-time tiny weight re-layouts (done by XLA, outside the hot path).
    wbb = jnp.transpose(bb_w.reshape(9, Cin, Cmid), (2, 0, 1)).reshape(Cmid, 9 * Cin)
    bbb = bb_b.reshape(Cmid, 1)
    wdec = dec_w.T                                    # (Cout, Cmid)
    bdec = dec_b.reshape(Cout, 1)

    x_flat = x_nchw.reshape(B, Cin, HW)               # free view, NCHW-native

    kernel = functools.partial(fused_backbone_decoder_kernel, H=H, W=W)

    # NOTE: for production H, W add a spatial grid axis (row tiles + 1-row
    # halo) so v7x's 64 MiB VMEM and both TensorCores stay fed; at 16x16 one
    # image per step is plenty and grid=(B,) already exposes parallel work.
    out_flat = pl.pallas_call(
        kernel,
        out_shape=jax.ShapeDtypeStruct((B, Cout, HW), x_nchw.dtype),
        grid_spec=pltpu.PrefetchScalarGridSpec(
            num_scalar_prefetch=0,
            grid=(B,),
            in_specs=[
                pl.BlockSpec((1, Cin, HW), lambda i: (i, 0, 0)),
                pl.BlockSpec((Cmid, 9 * Cin), lambda i: (0, 0)),   # resident
                pl.BlockSpec((Cmid, 1), lambda i: (0, 0)),          # resident
                pl.BlockSpec((Cout, Cmid), lambda i: (0, 0)),       # resident
                pl.BlockSpec((Cout, 1), lambda i: (0, 0)),          # resident
            ],
            out_specs=pl.BlockSpec((1, Cout, HW), lambda i: (i, 0, 0)),
        ),
        compiler_params=pltpu.CompilerParams(
            dimension_semantics=("parallel",),
            vmem_limit_bytes=32 * 1024 * 1024,
        ),
    )(x_flat, wbb, bbb, wdec, bdec)

    return out_flat.reshape(B, Cout, H, W)


def init_params(cin=4, cmid=8, cout=2):
    # Deterministic synthetic parameter init (no checkpoint load).
    k = jax.random.PRNGKey(42)
    k1, k2, k3, k4 = jax.random.split(k, 4)
    bb_w = jax.random.normal(k1, (3, 3, cin, cmid), jnp.float32) * 0.1
    bb_b = jax.random.normal(k2, (cmid,), jnp.float32) * 0.01
    dec_w = jax.random.normal(k3, (cmid, cout), jnp.float32) * 0.1
    dec_b = jax.random.normal(k4, (cout,), jnp.float32) * 0.01
    return {"bb_w": bb_w, "bb_b": bb_b, "dec_w": dec_w, "dec_b": dec_b}


def reference_forward(x_nchw, params):
    """Pure-JAX reference (lax.conv at HIGHEST precision) for a sanity check."""
    feat = jax.lax.conv_general_dilated(
        x_nchw, jnp.transpose(params["bb_w"], (3, 2, 0, 1)),  # OIHW
        window_strides=(1, 1), padding="SAME",
        dimension_numbers=("NCHW", "OIHW", "NCHW"),
        precision=lax.Precision.HIGHEST)
    feat = jax.nn.relu(feat + params["bb_b"][None, :, None, None])
    out = jax.lax.conv_general_dilated(
        feat, jnp.transpose(params["dec_w"], (1, 0))[:, :, None, None],
        window_strides=(1, 1), padding="VALID",
        dimension_numbers=("NCHW", "OIHW", "NCHW"),
        precision=lax.Precision.HIGHEST)
    return out + params["dec_b"][None, :, None, None]


if __name__ == "__main__":
    B, Cin, H, W = 2, 4, 16, 16
    Cmid, Cout = 8, 2
    x = jax.random.normal(jax.random.PRNGKey(0), (B, Cin, H, W), jnp.float32)
    params = init_params(cin=Cin, cmid=Cmid, cout=Cout)

    out = jax.block_until_ready(basic_model_forward(x, params))
    ref = jax.block_until_ready(reference_forward(x, params))

    assert out.shape == (B, Cout, H, W), out.shape
    max_err = float(jnp.max(jnp.abs(out - ref)))
    assert jnp.allclose(out, ref, atol=1e-4, rtol=1e-4), max_err
    print("KERNEL_OK")
</pallas_src>

<mosaic_0001>
module attributes {stable_mosaic.version = 11 : i64} {
  func.func @fused_backbone_decoder_kernel(%arg0: i32, %arg1: memref<1x4x256xf32, #tpu.memory_space<vmem>>, %arg2: memref<8x36xf32, #tpu.memory_space<vmem>>, %arg3: memref<8x1xf32, #tpu.memory_space<vmem>>, %arg4: memref<2x8xf32, #tpu.memory_space<vmem>>, %arg5: memref<2x1xf32, #tpu.memory_space<vmem>>, %arg6: memref<1x2x256xf32, #tpu.memory_space<vmem>>) attributes {dimension_semantics = [#tpu.dimension_semantics<parallel>], iteration_bounds = array<i64: 2>, scalar_prefetch = 0 : i64, scratch_operands = 0 : i64, tpu.core_type = #tpu.core_type<tc>, window_params = [{transform_indices = @transform_0, window_bounds = array<i64: 1, 4, 256>}, {pipeline_mode = #tpu.pipeline_mode<synchronous>, transform_indices = @transform_1, window_bounds = array<i64: 8, 36>}, {pipeline_mode = #tpu.pipeline_mode<synchronous>, transform_indices = @transform_2, window_bounds = array<i64: 8, 1>}, {pipeline_mode = #tpu.pipeline_mode<synchronous>, transform_indices = @transform_3, window_bounds = array<i64: 2, 8>}, {pipeline_mode = #tpu.pipeline_mode<synchronous>, transform_indices = @transform_4, window_bounds = array<i64: 2, 1>}, {transform_indices = @transform_5, window_bounds = array<i64: 1, 2, 256>}]} {
    %c0 = arith.constant 0 : index
    %c0_0 = arith.constant 0 : index
    %c0_1 = arith.constant 0 : index
    %0 = vector.load %arg1[%c0, %c0_0, %c0_1] : memref<1x4x256xf32, #tpu.memory_space<vmem>>, vector<1x4x256xf32>
    %1 = vector.shape_cast %0 : vector<1x4x256xf32> to vector<4x256xf32>
    %cst = arith.constant 0.000000e+00 : f32
    %2 = vector.broadcast %cst : f32 to vector<4x17xf32>
    %3 = tpu.concatenate %2, %1, %2 in 1 : vector<4x17xf32>, vector<4x256xf32>, vector<4x17xf32> -> vector<4x290xf32>
    %4 = tpu.iota {dimensions = array<i32: 1>} : vector<1x256xi32>
    %c16_i32 = arith.constant 16 : i32
    %c0_i32 = arith.constant 0 : i32
    %5 = arith.cmpi eq, %c16_i32, %c0_i32 : i32
    %c1_i32 = arith.constant 1 : i32
    %6 = arith.select %5, %c1_i32, %c16_i32 : i32
    %7 = vector.broadcast %6 : i32 to vector<1x256xi32>
    %8 = arith.remsi %4, %7 : vector<1x256xi32>
    %c0_i32_2 = arith.constant 0 : i32
    %9 = vector.broadcast %c0_i32_2 : i32 to vector<1x256xi32>
    %10 = arith.cmpi ne, %8, %9 : vector<1x256xi32>
    %c0_i32_3 = arith.constant 0 : i32
    %11 = vector.broadcast %c0_i32_3 : i32 to vector<1x256xi32>
    %12 = arith.cmpi slt, %8, %11 : vector<1x256xi32>
    %c0_i32_4 = arith.constant 0 : i32
    %13 = arith.cmpi slt, %6, %c0_i32_4 : i32
    %14 = vector.broadcast %13 : i1 to vector<1x256xi1>
    %15 = vector.broadcast %14 : vector<1x256xi1> to vector<1x256xi1>
    %16 = arith.xori %12, %15 : vector<1x256xi1>
    %17 = arith.andi %16, %10 : vector<1x256xi1>
    %18 = vector.broadcast %6 : i32 to vector<1x256xi32>
    %19 = arith.addi %8, %18 : vector<1x256xi32>
    %20 = arith.select %17, %19, %8 : vector<1x256xi1>, vector<1x256xi32>
    %c1_i32_5 = arith.constant 1 : i32
    %21 = vector.broadcast %c1_i32_5 : i32 to vector<1x256xi32>
    %22 = arith.cmpi sge, %20, %21 : vector<1x256xi32>
    %c14_i32 = arith.constant 14 : i32
    %23 = vector.broadcast %c14_i32 : i32 to vector<1x256xi32>
    %24 = arith.cmpi sle, %20, %23 : vector<1x256xi32>
    %c0_6 = arith.constant 0 : index
    %c0_7 = arith.constant 0 : index
    %25 = vector.load %arg2[%c0_6, %c0_7] : memref<8x36xf32, #tpu.memory_space<vmem>>, vector<8x36xf32>
    %c0_8 = arith.constant 0 : index
    %c0_9 = arith.constant 0 : index
    %26 = vector.load %arg4[%c0_8, %c0_9] : memref<2x8xf32, #tpu.memory_space<vmem>>, vector<2x8xf32>
    %c0_10 = arith.constant 0 : index
    %c0_11 = arith.constant 0 : index
    %27 = vector.load %arg3[%c0_10, %c0_11] : memref<8x1xf32, #tpu.memory_space<vmem>>, vector<8x1xf32>
    %28 = vector.shape_cast %27 : vector<8x1xf32> to vector<8x1xf32>
    %29 = vector.broadcast %28 : vector<8x1xf32> to vector<8x256xf32>
    %30 = vector.extract_strided_slice %3 {offsets = [0, 0], sizes = [4, 256], strides = [1, 1]} : vector<4x290xf32> to vector<4x256xf32>
    %cst_12 = arith.constant 0.000000e+00 : f32
    %31 = vector.shape_cast %22 : vector<1x256xi1> to vector<1x256xi1>
    %32 = vector.broadcast %31 : vector<1x256xi1> to vector<4x256xi1>
    %33 = vector.broadcast %cst_12 : f32 to vector<4x256xf32>
    %34 = arith.select %32, %30, %33 : vector<4x256xi1>, vector<4x256xf32>
    %35 = vector.extract_strided_slice %25 {offsets = [0, 0], sizes = [8, 1], strides = [1, 1]} : vector<8x36xf32> to vector<8x1xf32>
    %36 = vector.extract_strided_slice %34 {offsets = [0, 0], sizes = [1, 256], strides = [1, 1]} : vector<4x256xf32> to vector<1x256xf32>
    %37 = vector.broadcast %35 : vector<8x1xf32> to vector<8x256xf32>
    %38 = vector.broadcast %36 : vector<1x256xf32> to vector<8x256xf32>
    %39 = arith.mulf %37, %38 : vector<8x256xf32>
    %40 = arith.addf %29, %39 : vector<8x256xf32>
    %41 = vector.extract_strided_slice %25 {offsets = [0, 1], sizes = [8, 1], strides = [1, 1]} : vector<8x36xf32> to vector<8x1xf32>
    %42 = vector.extract_strided_slice %34 {offsets = [1, 0], sizes = [1, 256], strides = [1, 1]} : vector<4x256xf32> to vector<1x256xf32>
    %43 = vector.broadcast %41 : vector<8x1xf32> to vector<8x256xf32>
    %44 = vector.broadcast %42 : vector<1x256xf32> to vector<8x256xf32>
    %45 = arith.mulf %43, %44 : vector<8x256xf32>
    %46 = arith.addf %40, %45 : vector<8x256xf32>
    %47 = vector.extract_strided_slice %25 {offsets = [0, 2], sizes = [8, 1], strides = [1, 1]} : vector<8x36xf32> to vector<8x1xf32>
    %48 = vector.extract_strided_slice %34 {offsets = [2, 0], sizes = [1, 256], strides = [1, 1]} : vector<4x256xf32> to vector<1x256xf32>
    %49 = vector.broadcast %47 : vector<8x1xf32> to vector<8x256xf32>
    %50 = vector.broadcast %48 : vector<1x256xf32> to vector<8x256xf32>
    %51 = arith.mulf %49, %50 : vector<8x256xf32>
    %52 = arith.addf %46, %51 : vector<8x256xf32>
    %53 = vector.extract_strided_slice %25 {offsets = [0, 3], sizes = [8, 1], strides = [1, 1]} : vector<8x36xf32> to vector<8x1xf32>
    %54 = vector.extract_strided_slice %34 {offsets = [3, 0], sizes = [1, 256], strides = [1, 1]} : vector<4x256xf32> to vector<1x256xf32>
    %55 = vector.broadcast %53 : vector<8x1xf32> to vector<8x256xf32>
    %56 = vector.broadcast %54 : vector<1x256xf32> to vector<8x256xf32>
    %57 = arith.mulf %55, %56 : vector<8x256xf32>
    %58 = arith.addf %52, %57 : vector<8x256xf32>
    %59 = vector.extract_strided_slice %3 {offsets = [0, 1], sizes = [4, 256], strides = [1, 1]} : vector<4x290xf32> to vector<4x256xf32>
    %60 = vector.extract_strided_slice %25 {offsets = [0, 4], sizes = [8, 1], strides = [1, 1]} : vector<8x36xf32> to vector<8x1xf32>
    %61 = vector.extract_strided_slice %59 {offsets = [0, 0], sizes = [1, 256], strides = [1, 1]} : vector<4x256xf32> to vector<1x256xf32>
    %62 = vector.broadcast %60 : vector<8x1xf32> to vector<8x256xf32>
    %63 = vector.broadcast %61 : vector<1x256xf32> to vector<8x256xf32>
    %64 = arith.mulf %62, %63 : vector<8x256xf32>
    %65 = arith.addf %58, %64 : vector<8x256xf32>
    %66 = vector.extract_strided_slice %25 {offsets = [0, 5], sizes = [8, 1], strides = [1, 1]} : vector<8x36xf32> to vector<8x1xf32>
    %67 = vector.extract_strided_slice %59 {offsets = [1, 0], sizes = [1, 256], strides = [1, 1]} : vector<4x256xf32> to vector<1x256xf32>
    %68 = vector.broadcast %66 : vector<8x1xf32> to vector<8x256xf32>
    %69 = vector.broadcast %67 : vector<1x256xf32> to vector<8x256xf32>
    %70 = arith.mulf %68, %69 : vector<8x256xf32>
    %71 = arith.addf %65, %70 : vector<8x256xf32>
    %72 = vector.extract_strided_slice %25 {offsets = [0, 6], sizes = [8, 1], strides = [1, 1]} : vector<8x36xf32> to vector<8x1xf32>
    %73 = vector.extract_strided_slice %59 {offsets = [2, 0], sizes = [1, 256], strides = [1, 1]} : vector<4x256xf32> to vector<1x256xf32>
    %74 = vector.broadcast %72 : vector<8x1xf32> to vector<8x256xf32>
    %75 = vector.broadcast %73 : vector<1x256xf32> to vector<8x256xf32>
    %76 = arith.mulf %74, %75 : vector<8x256xf32>
    %77 = arith.addf %71, %76 : vector<8x256xf32>
    %78 = vector.extract_strided_slice %25 {offsets = [0, 7], sizes = [8, 1], strides = [1, 1]} : vector<8x36xf32> to vector<8x1xf32>
    %79 = vector.extract_strided_slice %59 {offsets = [3, 0], sizes = [1, 256], strides = [1, 1]} : vector<4x256xf32> to vector<1x256xf32>
    %80 = vector.broadcast %78 : vector<8x1xf32> to vector<8x256xf32>
    %81 = vector.broadcast %79 : vector<1x256xf32> to vector<8x256xf32>
    %82 = arith.mulf %80, %81 : vector<8x256xf32>
    %83 = arith.addf %77, %82 : vector<8x256xf32>
    %84 = vector.extract_strided_slice %3 {offsets = [0, 2], sizes = [4, 256], strides = [1, 1]} : vector<4x290xf32> to vector<4x256xf32>
    %cst_13 = arith.constant 0.000000e+00 : f32
    %85 = vector.shape_cast %24 : vector<1x256xi1> to vector<1x256xi1>
    %86 = vector.broadcast %85 : vector<1x256xi1> to vector<4x256xi1>
    %87 = vector.broadcast %cst_13 : f32 to vector<4x256xf32>
    %88 = arith.select %86, %84, %87 : vector<4x256xi1>, vector<4x256xf32>
    %89 = vector.extract_strided_slice %25 {offsets = [0, 8], sizes = [8, 1], strides = [1, 1]} : vector<8x36xf32> to vector<8x1xf32>
    %90 = vector.extract_strided_slice %88 {offsets = [0, 0], sizes = [1, 256], strides = [1, 1]} : vector<4x256xf32> to vector<1x256xf32>
    %91 = vector.broadcast %89 : vector<8x1xf32> to vector<8x256xf32>
    %92 = vector.broadcast %90 : vector<1x256xf32> to vector<8x256xf32>
    %93 = arith.mulf %91, %92 : vector<8x256xf32>
    %94 = arith.addf %83, %93 : vector<8x256xf32>
    %95 = vector.extract_strided_slice %25 {offsets = [0, 9], sizes = [8, 1], strides = [1, 1]} : vector<8x36xf32> to vector<8x1xf32>
    %96 = vector.extract_strided_slice %88 {offsets = [1, 0], sizes = [1, 256], strides = [1, 1]} : vector<4x256xf32> to vector<1x256xf32>
    %97 = vector.broadcast %95 : vector<8x1xf32> to vector<8x256xf32>
    %98 = vector.broadcast %96 : vector<1x256xf32> to vector<8x256xf32>
    %99 = arith.mulf %97, %98 : vector<8x256xf32>
    %100 = arith.addf %94, %99 : vector<8x256xf32>
    %101 = vector.extract_strided_slice %25 {offsets = [0, 10], sizes = [8, 1], strides = [1, 1]} : vector<8x36xf32> to vector<8x1xf32>
    %102 = vector.extract_strided_slice %88 {offsets = [2, 0], sizes = [1, 256], strides = [1, 1]} : vector<4x256xf32> to vector<1x256xf32>
    %103 = vector.broadcast %101 : vector<8x1xf32> to vector<8x256xf32>
    %104 = vector.broadcast %102 : vector<1x256xf32> to vector<8x256xf32>
    %105 = arith.mulf %103, %104 : vector<8x256xf32>
    %106 = arith.addf %100, %105 : vector<8x256xf32>
    %107 = vector.extract_strided_slice %25 {offsets = [0, 11], sizes = [8, 1], strides = [1, 1]} : vector<8x36xf32> to vector<8x1xf32>
    %108 = vector.extract_strided_slice %88 {offsets = [3, 0], sizes = [1, 256], strides = [1, 1]} : vector<4x256xf32> to vector<1x256xf32>
    %109 = vector.broadcast %107 : vector<8x1xf32> to vector<8x256xf32>
    %110 = vector.broadcast %108 : vector<1x256xf32> to vector<8x256xf32>
    %111 = arith.mulf %109, %110 : vector<8x256xf32>
    %112 = arith.addf %106, %111 : vector<8x256xf32>
    %113 = vector.extract_strided_slice %3 {offsets = [0, 16], sizes = [4, 256], strides = [1, 1]} : vector<4x290xf32> to vector<4x256xf32>
    %cst_14 = arith.constant 0.000000e+00 : f32
    %114 = vector.shape_cast %22 : vector<1x256xi1> to vector<1x256xi1>
    %115 = vector.broadcast %114 : vector<1x256xi1> to vector<4x256xi1>
    %116 = vector.broadcast %cst_14 : f32 to vector<4x256xf32>
    %117 = arith.select %115, %113, %116 : vector<4x256xi1>, vector<4x256xf32>
    %118 = vector.extract_strided_slice %25 {offsets = [0, 12], sizes = [8, 1], strides = [1, 1]} : vector<8x36xf32> to vector<8x1xf32>
    %119 = vector.extract_strided_slice %117 {offsets = [0, 0], sizes = [1, 256], strides = [1, 1]} : vector<4x256xf32> to vector<1x256xf32>
    %120 = vector.broadcast %118 : vector<8x1xf32> to vector<8x256xf32>
    %121 = vector.broadcast %119 : vector<1x256xf32> to vector<8x256xf32>
    %122 = arith.mulf %120, %121 : vector<8x256xf32>
    %123 = arith.addf %112, %122 : vector<8x256xf32>
    %124 = vector.extract_strided_slice %25 {offsets = [0, 13], sizes = [8, 1], strides = [1, 1]} : vector<8x36xf32> to vector<8x1xf32>
    %125 = vector.extract_strided_slice %117 {offsets = [1, 0], sizes = [1, 256], strides = [1, 1]} : vector<4x256xf32> to vector<1x256xf32>
    %126 = vector.broadcast %124 : vector<8x1xf32> to vector<8x256xf32>
    %127 = vector.broadcast %125 : vector<1x256xf32> to vector<8x256xf32>
    %128 = arith.mulf %126, %127 : vector<8x256xf32>
    %129 = arith.addf %123, %128 : vector<8x256xf32>
    %130 = vector.extract_strided_slice %25 {offsets = [0, 14], sizes = [8, 1], strides = [1, 1]} : vector<8x36xf32> to vector<8x1xf32>
    %131 = vector.extract_strided_slice %117 {offsets = [2, 0], sizes = [1, 256], strides = [1, 1]} : vector<4x256xf32> to vector<1x256xf32>
    %132 = vector.broadcast %130 : vector<8x1xf32> to vector<8x256xf32>
    %133 = vector.broadcast %131 : vector<1x256xf32> to vector<8x256xf32>
    %134 = arith.mulf %132, %133 : vector<8x256xf32>
    %135 = arith.addf %129, %134 : vector<8x256xf32>
    %136 = vector.extract_strided_slice %25 {offsets = [0, 15], sizes = [8, 1], strides = [1, 1]} : vector<8x36xf32> to vector<8x1xf32>
    %137 = vector.extract_strided_slice %117 {offsets = [3, 0], sizes = [1, 256], strides = [1, 1]} : vector<4x256xf32> to vector<1x256xf32>
    %138 = vector.broadcast %136 : vector<8x1xf32> to vector<8x256xf32>
    %139 = vector.broadcast %137 : vector<1x256xf32> to vector<8x256xf32>
    %140 = arith.mulf %138, %139 : vector<8x256xf32>
    %141 = arith.addf %135, %140 : vector<8x256xf32>
    %142 = vector.extract_strided_slice %3 {offsets = [0, 17], sizes = [4, 256], strides = [1, 1]} : vector<4x290xf32> to vector<4x256xf32>
    %143 = vector.extract_strided_slice %25 {offsets = [0, 16], sizes = [8, 1], strides = [1, 1]} : vector<8x36xf32> to vector<8x1xf32>
    %144 = vector.extract_strided_slice %142 {offsets = [0, 0], sizes = [1, 256], strides = [1, 1]} : vector<4x256xf32> to vector<1x256xf32>
    %145 = vector.broadcast %143 : vector<8x1xf32> to vector<8x256xf32>
    %146 = vector.broadcast %144 : vector<1x256xf32> to vector<8x256xf32>
    %147 = arith.mulf %145, %146 : vector<8x256xf32>
    %148 = arith.addf %141, %147 : vector<8x256xf32>
    %149 = vector.extract_strided_slice %25 {offsets = [0, 17], sizes = [8, 1], strides = [1, 1]} : vector<8x36xf32> to vector<8x1xf32>
    %150 = vector.extract_strided_slice %142 {offsets = [1, 0], sizes = [1, 256], strides = [1, 1]} : vector<4x256xf32> to vector<1x256xf32>
    %151 = vector.broadcast %149 : vector<8x1xf32> to vector<8x256xf32>
    %152 = vector.broadcast %150 : vector<1x256xf32> to vector<8x256xf32>
    %153 = arith.mulf %151, %152 : vector<8x256xf32>
    %154 = arith.addf %148, %153 : vector<8x256xf32>
    %155 = vector.extract_strided_slice %25 {offsets = [0, 18], sizes = [8, 1], strides = [1, 1]} : vector<8x36xf32> to vector<8x1xf32>
    %156 = vector.extract_strided_slice %142 {offsets = [2, 0], sizes = [1, 256], strides = [1, 1]} : vector<4x256xf32> to vector<1x256xf32>
    %157 = vector.broadcast %155 : vector<8x1xf32> to vector<8x256xf32>
    %158 = vector.broadcast %156 : vector<1x256xf32> to vector<8x256xf32>
    %159 = arith.mulf %157, %158 : vector<8x256xf32>
    %160 = arith.addf %154, %159 : vector<8x256xf32>
    %161 = vector.extract_strided_slice %25 {offsets = [0, 19], sizes = [8, 1], strides = [1, 1]} : vector<8x36xf32> to vector<8x1xf32>
    %162 = vector.extract_strided_slice %142 {offsets = [3, 0], sizes = [1, 256], strides = [1, 1]} : vector<4x256xf32> to vector<1x256xf32>
    %163 = vector.broadcast %161 : vector<8x1xf32> to vector<8x256xf32>
    %164 = vector.broadcast %162 : vector<1x256xf32> to vector<8x256xf32>
    %165 = arith.mulf %163, %164 : vector<8x256xf32>
    %166 = arith.addf %160, %165 : vector<8x256xf32>
    %167 = vector.extract_strided_slice %3 {offsets = [0, 18], sizes = [4, 256], strides = [1, 1]} : vector<4x290xf32> to vector<4x256xf32>
    %cst_15 = arith.constant 0.000000e+00 : f32
    %168 = vector.shape_cast %24 : vector<1x256xi1> to vector<1x256xi1>
    %169 = vector.broadcast %168 : vector<1x256xi1> to vector<4x256xi1>
    %170 = vector.broadcast %cst_15 : f32 to vector<4x256xf32>
    %171 = arith.select %169, %167, %170 : vector<4x256xi1>, vector<4x256xf32>
    %172 = vector.extract_strided_slice %25 {offsets = [0, 20], sizes = [8, 1], strides = [1, 1]} : vector<8x36xf32> to vector<8x1xf32>
    %173 = vector.extract_strided_slice %171 {offsets = [0, 0], sizes = [1, 256], strides = [1, 1]} : vector<4x256xf32> to vector<1x256xf32>
    %174 = vector.broadcast %172 : vector<8x1xf32> to vector<8x256xf32>
    %175 = vector.broadcast %173 : vector<1x256xf32> to vector<8x256xf32>
    %176 = arith.mulf %174, %175 : vector<8x256xf32>
    %177 = arith.addf %166, %176 : vector<8x256xf32>
    %178 = vector.extract_strided_slice %25 {offsets = [0, 21], sizes = [8, 1], strides = [1, 1]} : vector<8x36xf32> to vector<8x1xf32>
    %179 = vector.extract_strided_slice %171 {offsets = [1, 0], sizes = [1, 256], strides = [1, 1]} : vector<4x256xf32> to vector<1x256xf32>
    %180 = vector.broadcast %178 : vector<8x1xf32> to vector<8x256xf32>
    %181 = vector.broadcast %179 : vector<1x256xf32> to vector<8x256xf32>
    %182 = arith.mulf %180, %181 : vector<8x256xf32>
    %183 = arith.addf %177, %182 : vector<8x256xf32>
    %184 = vector.extract_strided_slice %25 {offsets = [0, 22], sizes = [8, 1], strides = [1, 1]} : vector<8x36xf32> to vector<8x1xf32>
    %185 = vector.extract_strided_slice %171 {offsets = [2, 0], sizes = [1, 256], strides = [1, 1]} : vector<4x256xf32> to vector<1x256xf32>
    %186 = vector.broadcast %184 : vector<8x1xf32> to vector<8x256xf32>
    %187 = vector.broadcast %185 : vector<1x256xf32> to vector<8x256xf32>
    %188 = arith.mulf %186, %187 : vector<8x256xf32>
    %189 = arith.addf %183, %188 : vector<8x256xf32>
    %190 = vector.extract_strided_slice %25 {offsets = [0, 23], sizes = [8, 1], strides = [1, 1]} : vector<8x36xf32> to vector<8x1xf32>
    %191 = vector.extract_strided_slice %171 {offsets = [3, 0], sizes = [1, 256], strides = [1, 1]} : vector<4x256xf32> to vector<1x256xf32>
    %192 = vector.broadcast %190 : vector<8x1xf32> to vector<8x256xf32>
    %193 = vector.broadcast %191 : vector<1x256xf32> to vector<8x256xf32>
    %194 = arith.mulf %192, %193 : vector<8x256xf32>
    %195 = arith.addf %189, %194 : vector<8x256xf32>
    %196 = vector.extract_strided_slice %3 {offsets = [0, 32], sizes = [4, 256], strides = [1, 1]} : vector<4x290xf32> to vector<4x256xf32>
    %cst_16 = arith.constant 0.000000e+00 : f32
    %197 = vector.shape_cast %22 : vector<1x256xi1> to vector<1x256xi1>
    %198 = vector.broadcast %197 : vector<1x256xi1> to vector<4x256xi1>
    %199 = vector.broadcast %cst_16 : f32 to vector<4x256xf32>
    %200 = arith.select %198, %196, %199 : vector<4x256xi1>, vector<4x256xf32>
    %201 = vector.extract_strided_slice %25 {offsets = [0, 24], sizes = [8, 1], strides = [1, 1]} : vector<8x36xf32> to vector<8x1xf32>
    %202 = vector.extract_strided_slice %200 {offsets = [0, 0], sizes = [1, 256], strides = [1, 1]} : vector<4x256xf32> to vector<1x256xf32>
    %203 = vector.broadcast %201 : vector<8x1xf32> to vector<8x256xf32>
    %204 = vector.broadcast %202 : vector<1x256xf32> to vector<8x256xf32>
    %205 = arith.mulf %203, %204 : vector<8x256xf32>
    %206 = arith.addf %195, %205 : vector<8x256xf32>
    %207 = vector.extract_strided_slice %25 {offsets = [0, 25], sizes = [8, 1], strides = [1, 1]} : vector<8x36xf32> to vector<8x1xf32>
    %208 = vector.extract_strided_slice %200 {offsets = [1, 0], sizes = [1, 256], strides = [1, 1]} : vector<4x256xf32> to vector<1x256xf32>
    %209 = vector.broadcast %207 : vector<8x1xf32> to vector<8x256xf32>
    %210 = vector.broadcast %208 : vector<1x256xf32> to vector<8x256xf32>
    %211 = arith.mulf %209, %210 : vector<8x256xf32>
    %212 = arith.addf %206, %211 : vector<8x256xf32>
    %213 = vector.extract_strided_slice %25 {offsets = [0, 26], sizes = [8, 1], strides = [1, 1]} : vector<8x36xf32> to vector<8x1xf32>
    %214 = vector.extract_strided_slice %200 {offsets = [2, 0], sizes = [1, 256], strides = [1, 1]} : vector<4x256xf32> to vector<1x256xf32>
    %215 = vector.broadcast %213 : vector<8x1xf32> to vector<8x256xf32>
    %216 = vector.broadcast %214 : vector<1x256xf32> to vector<8x256xf32>
    %217 = arith.mulf %215, %216 : vector<8x256xf32>
    %218 = arith.addf %212, %217 : vector<8x256xf32>
    %219 = vector.extract_strided_slice %25 {offsets = [0, 27], sizes = [8, 1], strides = [1, 1]} : vector<8x36xf32> to vector<8x1xf32>
    %220 = vector.extract_strided_slice %200 {offsets = [3, 0], sizes = [1, 256], strides = [1, 1]} : vector<4x256xf32> to vector<1x256xf32>
    %221 = vector.broadcast %219 : vector<8x1xf32> to vector<8x256xf32>
    %222 = vector.broadcast %220 : vector<1x256xf32> to vector<8x256xf32>
    %223 = arith.mulf %221, %222 : vector<8x256xf32>
    %224 = arith.addf %218, %223 : vector<8x256xf32>
    %225 = vector.extract_strided_slice %3 {offsets = [0, 33], sizes = [4, 256], strides = [1, 1]} : vector<4x290xf32> to vector<4x256xf32>
    %226 = vector.extract_strided_slice %25 {offsets = [0, 28], sizes = [8, 1], strides = [1, 1]} : vector<8x36xf32> to vector<8x1xf32>
    %227 = vector.extract_strided_slice %225 {offsets = [0, 0], sizes = [1, 256], strides = [1, 1]} : vector<4x256xf32> to vector<1x256xf32>
    %228 = vector.broadcast %226 : vector<8x1xf32> to vector<8x256xf32>
    %229 = vector.broadcast %227 : vector<1x256xf32> to vector<8x256xf32>
    %230 = arith.mulf %228, %229 : vector<8x256xf32>
    %231 = arith.addf %224, %230 : vector<8x256xf32>
    %232 = vector.extract_strided_slice %25 {offsets = [0, 29], sizes = [8, 1], strides = [1, 1]} : vector<8x36xf32> to vector<8x1xf32>
    %233 = vector.extract_strided_slice %225 {offsets = [1, 0], sizes = [1, 256], strides = [1, 1]} : vector<4x256xf32> to vector<1x256xf32>
    %234 = vector.broadcast %232 : vector<8x1xf32> to vector<8x256xf32>
    %235 = vector.broadcast %233 : vector<1x256xf32> to vector<8x256xf32>
    %236 = arith.mulf %234, %235 : vector<8x256xf32>
    %237 = arith.addf %231, %236 : vector<8x256xf32>
    %238 = vector.extract_strided_slice %25 {offsets = [0, 30], sizes = [8, 1], strides = [1, 1]} : vector<8x36xf32> to vector<8x1xf32>
    %239 = vector.extract_strided_slice %225 {offsets = [2, 0], sizes = [1, 256], strides = [1, 1]} : vector<4x256xf32> to vector<1x256xf32>
    %240 = vector.broadcast %238 : vector<8x1xf32> to vector<8x256xf32>
    %241 = vector.broadcast %239 : vector<1x256xf32> to vector<8x256xf32>
    %242 = arith.mulf %240, %241 : vector<8x256xf32>
    %243 = arith.addf %237, %242 : vector<8x256xf32>
    %244 = vector.extract_strided_slice %25 {offsets = [0, 31], sizes = [8, 1], strides = [1, 1]} : vector<8x36xf32> to vector<8x1xf32>
    %245 = vector.extract_strided_slice %225 {offsets = [3, 0], sizes = [1, 256], strides = [1, 1]} : vector<4x256xf32> to vector<1x256xf32>
    %246 = vector.broadcast %244 : vector<8x1xf32> to vector<8x256xf32>
    %247 = vector.broadcast %245 : vector<1x256xf32> to vector<8x256xf32>
    %248 = arith.mulf %246, %247 : vector<8x256xf32>
    %249 = arith.addf %243, %248 : vector<8x256xf32>
    %250 = vector.extract_strided_slice %3 {offsets = [0, 34], sizes = [4, 256], strides = [1, 1]} : vector<4x290xf32> to vector<4x256xf32>
    %cst_17 = arith.constant 0.000000e+00 : f32
    %251 = vector.shape_cast %24 : vector<1x256xi1> to vector<1x256xi1>
    %252 = vector.broadcast %251 : vector<1x256xi1> to vector<4x256xi1>
    %253 = vector.broadcast %cst_17 : f32 to vector<4x256xf32>
    %254 = arith.select %252, %250, %253 : vector<4x256xi1>, vector<4x256xf32>
    %255 = vector.extract_strided_slice %25 {offsets = [0, 32], sizes = [8, 1], strides = [1, 1]} : vector<8x36xf32> to vector<8x1xf32>
    %256 = vector.extract_strided_slice %254 {offsets = [0, 0], sizes = [1, 256], strides = [1, 1]} : vector<4x256xf32> to vector<1x256xf32>
    %257 = vector.broadcast %255 : vector<8x1xf32> to vector<8x256xf32>
    %258 = vector.broadcast %256 : vector<1x256xf32> to vector<8x256xf32>
    %259 = arith.mulf %257, %258 : vector<8x256xf32>
    %260 = arith.addf %249, %259 : vector<8x256xf32>
    %261 = vector.extract_strided_slice %25 {offsets = [0, 33], sizes = [8, 1], strides = [1, 1]} : vector<8x36xf32> to vector<8x1xf32>
    %262 = vector.extract_strided_slice %254 {offsets = [1, 0], sizes = [1, 256], strides = [1, 1]} : vector<4x256xf32> to vector<1x256xf32>
    %263 = vector.broadcast %261 : vector<8x1xf32> to vector<8x256xf32>
    %264 = vector.broadcast %262 : vector<1x256xf32> to vector<8x256xf32>
    %265 = arith.mulf %263, %264 : vector<8x256xf32>
    %266 = arith.addf %260, %265 : vector<8x256xf32>
    %267 = vector.extract_strided_slice %25 {offsets = [0, 34], sizes = [8, 1], strides = [1, 1]} : vector<8x36xf32> to vector<8x1xf32>
    %268 = vector.extract_strided_slice %254 {offsets = [2, 0], sizes = [1, 256], strides = [1, 1]} : vector<4x256xf32> to vector<1x256xf32>
    %269 = vector.broadcast %267 : vector<8x1xf32> to vector<8x256xf32>
    %270 = vector.broadcast %268 : vector<1x256xf32> to vector<8x256xf32>
    %271 = arith.mulf %269, %270 : vector<8x256xf32>
    %272 = arith.addf %266, %271 : vector<8x256xf32>
    %273 = vector.extract_strided_slice %25 {offsets = [0, 35], sizes = [8, 1], strides = [1, 1]} : vector<8x36xf32> to vector<8x1xf32>
    %274 = vector.extract_strided_slice %254 {offsets = [3, 0], sizes = [1, 256], strides = [1, 1]} : vector<4x256xf32> to vector<1x256xf32>
    %275 = vector.broadcast %273 : vector<8x1xf32> to vector<8x256xf32>
    %276 = vector.broadcast %274 : vector<1x256xf32> to vector<8x256xf32>
    %277 = arith.mulf %275, %276 : vector<8x256xf32>
    %278 = arith.addf %272, %277 : vector<8x256xf32>
    %cst_18 = arith.constant 0.000000e+00 : f32
    %279 = vector.broadcast %cst_18 : f32 to vector<8x256xf32>
    %280 = arith.maximumf %278, %279 : vector<8x256xf32>
    %c0_19 = arith.constant 0 : index
    %c0_20 = arith.constant 0 : index
    %281 = vector.load %arg5[%c0_19, %c0_20] : memref<2x1xf32, #tpu.memory_space<vmem>>, vector<2x1xf32>
    %282 = vector.shape_cast %281 : vector<2x1xf32> to vector<2x1xf32>
    %283 = vector.broadcast %282 : vector<2x1xf32> to vector<2x256xf32>
    %284 = vector.extract_strided_slice %26 {offsets = [0, 0], sizes = [2, 1], strides = [1, 1]} : vector<2x8xf32> to vector<2x1xf32>
    %285 = vector.extract_strided_slice %280 {offsets = [0, 0], sizes = [1, 256], strides = [1, 1]} : vector<8x256xf32> to vector<1x256xf32>
    %286 = vector.broadcast %284 : vector<2x1xf32> to vector<2x256xf32>
    %287 = vector.broadcast %285 : vector<1x256xf32> to vector<2x256xf32>
    %288 = arith.mulf %286, %287 : vector<2x256xf32>
    %289 = arith.addf %283, %288 : vector<2x256xf32>
    %290 = vector.extract_strided_slice %26 {offsets = [0, 1], sizes = [2, 1], strides = [1, 1]} : vector<2x8xf32> to vector<2x1xf32>
    %291 = vector.extract_strided_slice %280 {offsets = [1, 0], sizes = [1, 256], strides = [1, 1]} : vector<8x256xf32> to vector<1x256xf32>
    %292 = vector.broadcast %290 : vector<2x1xf32> to vector<2x256xf32>
    %293 = vector.broadcast %291 : vector<1x256xf32> to vector<2x256xf32>
    %294 = arith.mulf %292, %293 : vector<2x256xf32>
    %295 = arith.addf %289, %294 : vector<2x256xf32>
    %296 = vector.extract_strided_slice %26 {offsets = [0, 2], sizes = [2, 1], strides = [1, 1]} : vector<2x8xf32> to vector<2x1xf32>
    %297 = vector.extract_strided_slice %280 {offsets = [2, 0], sizes = [1, 256], strides = [1, 1]} : vector<8x256xf32> to vector<1x256xf32>
    %298 = vector.broadcast %296 : vector<2x1xf32> to vector<2x256xf32>
    %299 = vector.broadcast %297 : vector<1x256xf32> to vector<2x256xf32>
    %300 = arith.mulf %298, %299 : vector<2x256xf32>
    %301 = arith.addf %295, %300 : vector<2x256xf32>
    %302 = vector.extract_strided_slice %26 {offsets = [0, 3], sizes = [2, 1], strides = [1, 1]} : vector<2x8xf32> to vector<2x1xf32>
    %303 = vector.extract_strided_slice %280 {offsets = [3, 0], sizes = [1, 256], strides = [1, 1]} : vector<8x256xf32> to vector<1x256xf32>
    %304 = vector.broadcast %302 : vector<2x1xf32> to vector<2x256xf32>
    %305 = vector.broadcast %303 : vector<1x256xf32> to vector<2x256xf32>
    %306 = arith.mulf %304, %305 : vector<2x256xf32>
    %307 = arith.addf %301, %306 : vector<2x256xf32>
    %308 = vector.extract_strided_slice %26 {offsets = [0, 4], sizes = [2, 1], strides = [1, 1]} : vector<2x8xf32> to vector<2x1xf32>
    %309 = vector.extract_strided_slice %280 {offsets = [4, 0], sizes = [1, 256], strides = [1, 1]} : vector<8x256xf32> to vector<1x256xf32>
    %310 = vector.broadcast %308 : vector<2x1xf32> to vector<2x256xf32>
    %311 = vector.broadcast %309 : vector<1x256xf32> to vector<2x256xf32>
    %312 = arith.mulf %310, %311 : vector<2x256xf32>
    %313 = arith.addf %307, %312 : vector<2x256xf32>
    %314 = vector.extract_strided_slice %26 {offsets = [0, 5], sizes = [2, 1], strides = [1, 1]} : vector<2x8xf32> to vector<2x1xf32>
    %315 = vector.extract_strided_slice %280 {offsets = [5, 0], sizes = [1, 256], strides = [1, 1]} : vector<8x256xf32> to vector<1x256xf32>
    %316 = vector.broadcast %314 : vector<2x1xf32> to vector<2x256xf32>
    %317 = vector.broadcast %315 : vector<1x256xf32> to vector<2x256xf32>
    %318 = arith.mulf %316, %317 : vector<2x256xf32>
    %319 = arith.addf %313, %318 : vector<2x256xf32>
    %320 = vector.extract_strided_slice %26 {offsets = [0, 6], sizes = [2, 1], strides = [1, 1]} : vector<2x8xf32> to vector<2x1xf32>
    %321 = vector.extract_strided_slice %280 {offsets = [6, 0], sizes = [1, 256], strides = [1, 1]} : vector<8x256xf32> to vector<1x256xf32>
    %322 = vector.broadcast %320 : vector<2x1xf32> to vector<2x256xf32>
    %323 = vector.broadcast %321 : vector<1x256xf32> to vector<2x256xf32>
    %324 = arith.mulf %322, %323 : vector<2x256xf32>
    %325 = arith.addf %319, %324 : vector<2x256xf32>
    %326 = vector.extract_strided_slice %26 {offsets = [0, 7], sizes = [2, 1], strides = [1, 1]} : vector<2x8xf32> to vector<2x1xf32>
    %327 = vector.extract_strided_slice %280 {offsets = [7, 0], sizes = [1, 256], strides = [1, 1]} : vector<8x256xf32> to vector<1x256xf32>
    %328 = vector.broadcast %326 : vector<2x1xf32> to vector<2x256xf32>
    %329 = vector.broadcast %327 : vector<1x256xf32> to vector<2x256xf32>
    %330 = arith.mulf %328, %329 : vector<2x256xf32>
    %331 = arith.addf %325, %330 : vector<2x256xf32>
    %332 = vector.shape_cast %331 : vector<2x256xf32> to vector<1x2x256xf32>
    %c0_21 = arith.constant 0 : index
    %c0_22 = arith.constant 0 : index
    %c0_23 = arith.constant 0 : index
    %333 = vector.load %arg6[%c0_21, %c0_22, %c0_23] : memref<1x2x256xf32, #tpu.memory_space<vmem>>, vector<1x2x256xf32>
    tpu.vector_store %arg6[%c0_21, %c0_22, %c0_23], %332 {strides = array<i32>} : memref<1x2x256xf32, #tpu.memory_space<vmem>>, vector<1x2x256xf32>,
    return
  }
  func.func @transform_0(%arg0: i32) -> (i32, i32, i32) {
    %c0_i32 = arith.constant 0 : i32
    %c0_i32_0 = arith.constant 0 : i32
    %c0_i32_1 = arith.constant 0 : i32
    return %arg0, %c0_i32, %c0_i32_0 : i32, i32, i32
  }
  func.func @transform_1(%arg0: i32) -> (i32, i32) {
    %c0_i32 = arith.constant 0 : i32
    %c0_i32_0 = arith.constant 0 : i32
    %c0_i32_1 = arith.constant 0 : i32
    return %c0_i32, %c0_i32_0 : i32, i32
  }
  func.func @transform_2(%arg0: i32) -> (i32, i32) {
    %c0_i32 = arith.constant 0 : i32
    %c0_i32_0 = arith.constant 0 : i32
    %c0_i32_1 = arith.constant 0 : i32
    return %c0_i32, %c0_i32_0 : i32, i32
  }
  func.func @transform_3(%arg0: i32) -> (i32, i32) {
    %c0_i32 = arith.constant 0 : i32
    %c0_i32_0 = arith.constant 0 : i32
    %c0_i32_1 = arith.constant 0 : i32
    return %c0_i32, %c0_i32_0 : i32, i32
  }
  func.func @transform_4(%arg0: i32) -> (i32, i32) {
    %c0_i32 = arith.constant 0 : i32
    %c0_i32_0 = arith.constant 0 : i32
    %c0_i32_1 = arith.constant 0 : i32
    return %c0_i32, %c0_i32_0 : i32, i32
  }
  func.func @transform_5(%arg0: i32) -> (i32, i32, i32) {
    %c0_i32 = arith.constant 0 : i32
    %c0_i32_0 = arith.constant 0 : i32
    %c0_i32_1 = arith.constant 0 : i32
    return %arg0, %c0_i32, %c0_i32_0 : i32, i32, i32
  }
}

</mosaic_0001>

<bundles_post_ra>
// kernel: tpu_custom_call.1
= control target key start
LH: loop header
LB: loop body
LE: loop exit
PB: predicated region body
PF: predicated region fallthrough
CT: control target
= control target key end

     0   :  { %10 = vsyncpa [#allocation3], 0  ;;  %s2224_s0 = inlined_call_operand.hbm [shape: f32[2,4,256], index: 0, kind: input, shape index: {}]   ;;  %s2225_s1 = inlined_call_operand.vmem [shape: f32[8,36], index: 1, kind: input, shape index: {}]   ;;  %s2226_s2 = inlined_call_operand.vmem [shape: f32[8,1], index: 2, kind: input, shape index: {}]   ;;  %s2227_s3 = inlined_call_operand.vmem [shape: f32[2,8], index: 3, kind: input, shape index: {}]   ;;  %s2228_s4 = inlined_call_operand.vmem [shape: f32[2,1], index: 4, kind: input, shape index: {}]   ;;  %s2229_s5 = inlined_call_operand.hbm [shape: f32[2,2,256], index: 5, kind: output, shape index: {}]  }
   0x1   :  { %12 = vsyncpa [#allocation3 + $0x1], 0 }
   0x2   :  { %13 = vsyncpa [#allocation4], 0 }
   0x3   :  { %15 = vsyncpa [#allocation4 + $0x1], 0  ;;  %s1629_s18 = smov 0   ;;  %s1631_s19 = smov 0  }
   0x4   :  { %s1633_s20 = smov 0   ;;  %s1635_s21 = smov 0  }
   0x5 LB: > { %s1650_s22 = sadd.s32 4294967295, %s1550_s21   ;;  %s1305_s23 = sadd.s32 4294967294, %s1550_s21   ;;  %s1550_s21 = sphi %s1635_s21, %s2254_s21   ;;  %s1546_s20 = sphi %s1633_s20, %s2253_s20   ;;  %s1542_s19 = sphi %s1631_s19, %s2252_s19   ;;  %s1538_s18 = sphi %s1629_s18, %s2251_s18  }
   0x6   : > { %s1654_s24 = sadd.s32 1, %s1550_s21   ;;  %s28_s25 = sadd.s32 1, %s1546_s20 }
   0x7   : > { %s25_s26 = ssub.s32 %s1550_s21, %s1654_s24  ;;  %p35_p0 = scmp.ne.s32.totalorder %s1546_s20, %s1542_s19 }
   0x8   : > { %p26_p1 = scmp.eq.s32.totalorder %s25_s26, 0  ;;  %p36_p2 = scmp.eq.s32.totalorder %s1550_s21, 0 }
   0x9   : > { %p41_p3 = scmp.ne.s32.totalorder %s1542_s19, %s1538_s18  ;;  %p42_p4 = scmp.eq.s32.totalorder %s1650_s22, 0 }
   0xa   : > { %s1666_s27 = scalar_select %p26_p1, %s1546_s20, %s28_s25  }
   0xb   : > { %p1668_p5 = por %p36_p2, %p35_p0  ;;  %p1672_p6 = por %p42_p4, %p41_p3 }
   0xc   : > { %p149_p7 = scmp.eq.s32.totalorder %s1650_s22, 1  ;;  %p155_p8 = scmp.eq.s32.totalorder %s1305_s23, 1 }
   0xd   : > { %s2233_s29 = scalar_select %p1672_p6, 1, 0 }
   0xe   : > { %p1334_p10 = scmp.lt.s32.totalorder %s1550_s21, 2  ;;  %p1679_p11 = por %p149_p7, %p35_p0 }
   0xf   : > { %p1683_p12 = por %p155_p8, %p41_p3  ;;  %s187_s7 = sand.u32 1, %s1546_s20  }
  0x10   : > { %s2234_s30 = scalar_select %p1679_p11, 1, 0 }
  0x11   : > { %s2235_s6 = scalar_select %p1683_p12, 1, 0 }
  0x12   : > { %s1320_s8 = sshll.u32 %s1550_s21, 7  ;;  %s1308_s9 = sshll.u32 %s187_s7, 3 }
  0x13   : > { %s1692_s12 = scalar_lea.hbm %s2224_s0, %s1320_s8  ;;  %s191_s13 = scalar_lea.vmem [#allocation2], %s1308_s9 }
  0x14   : > { %s199_s14 = sshll.u32 %s191_s13, 4  ;;  %p1696_p13 = pnand %p1334_p10, %p1668_p5  ;;  %s1700_s14 = int_to_ptr.vmem [resolvable:$true] %s199_s14 }
  0x15   : > { %s188_s16 = scalar_lea.sflag [#allocation3], %s187_s7  ;;  %s1458_s17 = scalar_lea.hbm %s1692_s12, 128 }
  0x16   : > { %p1459_p2 = scmp.ne.s32.totalorder %s1692_s12, %s1458_s17  ;;  %p1460_p3 = pneg %p1696_p13 }
  0x17   : > { %s1463_s26 = scalar_lea.hbm %s2224_s0, 256  ;;  %p1464_p5 = scmp.lt.s32.totalorder %s1692_s12, %s2224_s0 }
  0x18   : > { %p1461_p4 = pnand %p1460_p3, %p1459_p2  ;;  %p1465_p8 = scmp.lt.s32.totalorder %s1463_s26, %s1458_s17 }
  0x1a   : > { %p1462_p7 = pneg %p1461_p4  ;;  %p1466_p10 = por %p1465_p8, %p1464_p5 }
  0x1c   : > { %p1467_p9 = pnand %p1466_p10, %p1462_p7 }
  0x1e   : > { %1470 = shalt.err (!%p1467_p9)
}
  0x1f   : > { %s1471_s7 = scalar_lea.vmem %s1700_s14, 128  ;;  %s1552_s9 = smov [#allocation2]  }
  0x20   : > { %p1472_p0 = scmp.ne.s32.totalorder %s1700_s14, %s1471_s7  ;;  %s1476_s10 = sshll.u32 %s1552_s9, 4  ;;  %s1477_s10 = int_to_ptr.vmem [resolvable:$false] %s1476_s10 }
  0x21   : > { %s1478_s11 = scalar_lea.vmem %s1477_s10, 256  ;;  %p1479_p4 = scmp.lt.s32.totalorder %s1700_s14, %s1477_s10 }
  0x22   : > { %p1474_p1 = pnand %p1472_p0, %p1460_p3  ;;  %p1480_p12 = scmp.lt.s32.totalorder %s1478_s11, %s1471_s7 }
  0x24   : > { %p1475_p2 = pneg %p1474_p1  ;;  %p1481_p11 = por %p1480_p12, %p1479_p4 }
  0x26   : > { %p1482_p6 = pnand %p1481_p11, %p1475_p2 }
  0x28   : > { %1485 = shalt.err (!%p1482_p6)
}
  0x29   : > { %1329 = dma.hbm_to_vmem [thread:$0]  (!%p1696_p13), %s1692_s12, 128, %s1700_s14, %s188_s16  }
  0x2a   : > { %p2237_p9 = scmp.lt.s32.totalorder %s1550_s21, 3  ;;  %p2238_p7 = scmp.ge.s32.totalorder %s1550_s21, 1 }
  0x2c   : > { %p205_p0 = pnand %p2238_p7, %p2237_p9 }
  0x2d   : > { %s1727_s13 = sand.u32 (!%p205_p0), 1, %s1542_s19   ;;  %p2239_p6 = scmp.ne.s32.totalorder (!%p205_p0), %s2233_s29, 0 }
  0x2e   : > { %208 = sbr.rel (%p205_p0) target bundleno = 495 (0x1ef), region = 40  ;;  %s1312_s17 = sshll.u32 (!%p205_p0), %s1727_s13, 3 }
  0x2f   : > { %s211_s23 = scalar_lea.sflag (!%p205_p0), [#allocation3], %s1727_s13  ;;  %s214_s25 = scalar_lea.vmem (!%p205_p0), [#allocation2], %s1312_s17 }
  0x33   : > { %1529 = dma.done.wait (%p2239_p6), %s211_s23, 128  }
  0x34   : > { %1531 = vsyncadd (%p2239_p6), %s211_s23, 4294967168  ;;  %v1553_v0 = vmov 0   ;;  %v1554_v1 = vmov 1   ;;  %v288_v2 = vld [vmem:[%s2226_s2] sm:$0xff]  ;;  %s1555_s15 = smov 17   ;;  %v1556_v6 = vmov 2   ;;  %v255_v31 = vlaneseq }
  0x35   : > { %1413 = vset.pattern.permute.xlu1 %v1553_v0  ;;  %1414 = vset.pattern.permute.xlu0 %v1554_v1  ;;  %v241_v3 = vld [vmem:[%s214_s25] sm:$0xff]  ;;  %v1557_v7 = vmov 4   ;;  %v1558_v8 = vmov 3   ;;  %v1559_v9 = vmov 8   ;;  %v1560_v10 = vmov 5   ;;  %s1581_s29 = smov 126  }
  0x36   : > { %291 = vperm.xlu1 %1413, %v288_v2   ;;  %244 = vrot.lane.b32.xlu0 %v241_v3, %s1555_s15  ;;  %v243_v4 = vcombine.high %v241_v3, %v241_v3  ;;  %v1743_v5 = vld [vmem:[%s2225_s1] sm:$0xff]  ;;  %v1561_v11 = vmov 11   ;;  %v1562_v12 = vmov 6   ;;  %v1563_v13 = vmov 13   ;;  %s1582_s28 = smov 112   ;;  %s1583_s8 = smov 110  }
  0x37   : > { %v1564_v14 = vmov 7   ;;  %v1565_v15 = vmov 17   ;;  %v1566_v16 = vmov 9   ;;  %v1567_v17 = vmov 15   ;;  %s1584_s7 = smov 127   ;;  %s1585_s9 = smov 111  }
  0x38   : > { %v1568_v18 = vmov 10   ;;  %v1569_v19 = vmov 29   ;;  %v1570_v20 = vmov 12   ;;  %v1571_v21 = vmov 14   ;;  %s1587_s10 = smov 96   ;;  %s1591_s11 = smov 95  }
  0x39   : > { %v1572_v22 = vmov 16   ;;  %v1573_v23 = vmov 18   ;;  %v1574_v24 = vmov 19   ;;  %v1575_v25 = vmov 28   ;;  %s1595_s17 = smov 94   ;;  %s1321_s16 = sshll.u32 %s1650_s22, 6 }
  0x3a   : > { %302 = vperm.xlu1 %1413, %v1743_v5   ;;  %246 = vrot.lane.b32.xlu0 %v243_v4, %s1555_s15  ;;  %v1576_v26 = vmov 30   ;;  %v1577_v27 = vmov 22   ;;  %v1578_v28 = vmov 31   ;;  %v1579_v29 = vmov 20   ;;  %s1313_s15 = sshll.u32 %s1727_s13, 2  ;;  %p2248_p12 = scmp.ne.s32.totalorder %s2234_s30, 0 }
  0x3b   : > { %v1580_v30 = vmov 21   ;;  %v1776_v32 = vand.u32 127, %v255_v31  ;;  %vm248_vm0 = vcmask 138240   ;;  %v1787_v38 = vshrl.u32 %v255_v31, 7  ;;  %s240_s26 = scalar_lea.vmem [#allocation5], %s1313_s15 }
  0x3c   : > { %vm514_vm3 = vcmask 1031168   ;;  %vm757_vm5 = vcmask 900096   ;;  %vm591_vm6 = vcmask 916480   ;;  %vm393_vm7 = vcmask 1039360  }
  0x3d   : > { %v1779_v33 = vadd.s32 128, %v1776_v32  ;;  %v262_v35 = vand.u32 15, %v1776_v32  ;;  %v1808_v43 = vsub.s32 0, %v1787_v38  ;;  %v1820_v48 = vsub.s32 1, %v1787_v38 }
  0x3e   : > { %1415 = vset.pattern.permute.xlu1 %v1556_v6  ;;  %318 = vperm.xlu0 %1414, %v1743_v5   ;;  %v1829_v51 = vsub.s32 2, %v1787_v38  ;;  %v1839_v59 = vsub.s32 3, %v1787_v38  ;;  %vm678_vm9 = vcmask 908288   ;;  %vm834_vm10 = vcmask 785408  }
  0x3f   : > { %334 = vperm.xlu1 %1415, %v1743_v5   ;;  %v269_v36 = vand.u32 15, %v1779_v33  ;;  %vm1791_vm1 = vcmp.ge.s32.totalorder %v262_v35, 1  ;;  %vm1978_vm4 = vcmp.le.s32.totalorder %v262_v35, 14  ;;  %vm1000_vm11 = vcmask 769024  }
  0x40   : > { %vm921_vm12 = vcmask 777216  }
  0x41   : > { %vm1797_vm2 = vcmp.ge.s32.totalorder %v269_v36, 1  ;;  %vm2045_vm8 = vcmp.le.s32.totalorder %v269_v36, 14  ;;  %v1073_v36 = vld [vmem:[%s2228_s4] sm:$0x3] }
  0x42   : > { %1417 = vset.pattern.permute.xlu0 %v1557_v7 }
  0x43   : > { %1416 = vset.pattern.permute.xlu1 %v1558_v8  ;;  %366 = vperm.xlu0 %1417, %v1743_v5  }
  0x44   : > { %350 = vperm.xlu1 %1416, %v1743_v5  }
  0x47   : > { %1421 = vset.pattern.permute.xlu0 %v1559_v9 }
  0x48   : > { %1418 = vset.pattern.permute.xlu1 %v1560_v10  ;;  %522 = vperm.xlu0 %1421, %v1743_v5  }
  0x49   : > { %401 = vperm.xlu1 %1418, %v1743_v5  }
  0x4c   : > { %1424 = vset.pattern.permute.xlu0 %v1561_v11 }
  0x4d   : > { %1419 = vset.pattern.permute.xlu1 %v1562_v12  ;;  %570 = vperm.xlu0 %1424, %v1743_v5  }
  0x4e   : > { %435 = vperm.xlu1 %1419, %v1743_v5  }
  0x51   : > { %1426 = vset.pattern.permute.xlu0 %v1563_v13 }
  0x52   : > { %1420 = vset.pattern.permute.xlu1 %v1564_v14  ;;  %615 = vperm.xlu0 %1426, %v1743_v5  }
  0x53   : > { %469 = vperm.xlu1 %1420, %v1743_v5  }
  0x56   : > { %1429 = vset.pattern.permute.xlu0 %v1565_v15 }
  0x57   : > { %1422 = vset.pattern.permute.xlu1 %v1566_v16  ;;  %686 = vperm.xlu0 %1429, %v1743_v5  }
  0x58   : > { %538 = vperm.xlu1 %1422, %v1743_v5  }
  0x5b   : > { %1432 = vset.pattern.permute.xlu0 %v1567_v17 }
  0x5c   : > { %1423 = vset.pattern.permute.xlu1 %v1568_v18  ;;  %647 = vperm.xlu0 %1432, %v1743_v5  }
  0x5d   : > { %554 = vperm.xlu1 %1423, %v1743_v5  }
  0x60   : > { %1434 = vset.pattern.permute.xlu0 %v1569_v19 }
  0x61   : > { %1425 = vset.pattern.permute.xlu1 %v1570_v20  ;;  %929 = vperm.xlu0 %1434, %v1743_v5  }
  0x62   : > { %599 = vperm.xlu1 %1425, %v1743_v5  }
  0x65   : > { %1439 = vset.pattern.permute.xlu0 %v1577_v27 }
  0x66   : > { %1427 = vset.pattern.permute.xlu1 %v1571_v21 }
  0x67   : > { %631 = vperm.xlu1 %1427, %v1743_v5  }
  0x6b   : > { %1428 = vset.pattern.permute.xlu1 %v1572_v22 }
  0x6c   : > { %663 = vperm.xlu1 %1428, %v1743_v5  }
  0x70   : > { %1430 = vset.pattern.permute.xlu1 %v1573_v23 }
  0x71   : > { %708 = vperm.xlu1 %1430, %v1743_v5  }
  0x75   : > { %1431 = vset.pattern.permute.xlu1 %v1574_v24 }
  0x76   : > { %730 = vperm.xlu1 %1431, %v1743_v5  }
  0x7a   : > { %1433 = vset.pattern.permute.xlu1 %v1575_v25 }
  0x7b   : > { %906 = vperm.xlu1 %1433, %v1743_v5  }
  0x7f   : > { %1435 = vset.pattern.permute.xlu1 %v1576_v26 }
  0x80   : > { %951 = vperm.xlu1 %1435, %v1743_v5  }
  0x84   : > { %1436 = vset.pattern.permute.xlu1 %v1578_v28 }
  0x85   : > { %973 = vperm.xlu1 %1436, %v1743_v5  }
  0x89   : > { %1437 = vset.pattern.permute.xlu1 %v1579_v29 }
  0x8a   : > { %765 = vperm.xlu1 %1437, %v1743_v5  }
  0x8e   : > { %1438 = vset.pattern.permute.xlu1 %v1580_v30 }
  0xa8   : > { %v245_v34 = vpop.permute.xlu0 %244 }
  0xa9   : > { %v1784_v37 = vsel %vm248_vm0, 0.0, %v245_v34 }
  0xaa   : > { %508 = vrot.lane.b32.xlu1 %v1784_v37, %s1581_s29  ;;  %v298_v44 = vsel %vm1791_vm1, %v1784_v37, 0.0  ;;  %v1845_v11 = vrot.slane %v1784_v37, %v1808_v43  ;;  %v1868_v31 = vrot.slane %v1784_v37, %v1820_v48 }
  0xab   : > { %v308_v49 = vrot.slane %v298_v44, %v1808_v43  ;;  %v324_v53 = vrot.slane %v298_v44, %v1820_v48  ;;  %v340_v57 = vrot.slane %v298_v44, %v1829_v51  ;;  %v356_v17 = vrot.slane %v298_v44, %v1839_v59 }
  0xac   : > { %v247_v39 = vpop.permute.xlu0 %246 }
  0xad   : > { %v1802_v42 = vsel %vm248_vm0, %v245_v34, %v247_v39  ;;  %v1817_v46 = vsel %vm248_vm0, %v247_v39, 0.0 }
  0xae   : > { %585 = vrot.lane.b32.xlu1 %v1784_v37, %s1582_s28  ;;  %510 = vrot.lane.b32.xlu0 %v1802_v42, %s1581_s29  ;;  %v299_v45 = vsel %vm1797_vm2, %v1802_v42, 0.0  ;;  %v1849_v13 = vrot.slane %v1817_v46, %v1808_v43  ;;  %v1855_v22 = vrot.slane %v1802_v42, %v1808_v43  ;;  %v1874_v44 = vrot.slane %v1802_v42, %v1820_v48 }
  0xaf   : > { %v312_v50 = vrot.slane %v299_v45, %v1808_v43  ;;  %v328_v56 = vrot.slane %v299_v45, %v1820_v48  ;;  %v344_v58 = vrot.slane %v299_v45, %v1829_v51  ;;  %v360_v18 = vrot.slane %v299_v45, %v1839_v59 }
  0xb0   : > { %v1878_v45 = vrot.slane %v1817_v46, %v1820_v48 }
  0xb1   : > { %v292_v47 = vpop.permute.xlu1 %291 }
  0xb2   : > { %751 = vrot.lane.b32.xlu1 %v1784_v37, %s1583_s8  ;;  %589 = vrot.lane.b32.xlu0 %v1817_v46, %s1582_s28 }
  0xb5   : > { %v303_v52 = vpop.permute.xlu1 %302 }
  0xb6   : > { %v313_v54 = vmul.f32 %v308_v49, %v303_v52  ;;  %v314_v55 = vmul.f32 %v312_v50, %v303_v52  ;;  %512 = vrot.lane.b32.xlu1 %v1817_v46, %s1581_s29  ;;  %753 = vrot.lane.b32.xlu0 %v1802_v42, %s1583_s8  ;;  %v1884_v49 = vrot.slane %v1802_v42, %v1829_v51  ;;  %s1235_s29 = sshll.u32 %s240_s26, 4  ;;  %s1236_s29 = int_to_ptr.vmem [resolvable:$true] %s1235_s29 }
  0xb8   : > { %v315_v61 = vadd.f32 %v313_v54, %v292_v47  ;;  %v316_v62 = vadd.f32 %v314_v55, %v292_v47  ;;  %v1892_v54 = vrot.slane %v1784_v37, %v1829_v51 }
  0xb9   : > { %v319_v60 = vpop.permute.xlu0 %318 }
  0xba   : > { %v329_v63 = vmul.f32 %v324_v53, %v319_v60  ;;  %v330_v2 = vmul.f32 %v328_v56, %v319_v60  ;;  %v335_v3 = vpop.permute.xlu1 %334  ;;  %587 = vrot.lane.b32.xlu1 %v1802_v42, %s1582_s28  ;;  %v1898_v56 = vrot.slane %v1802_v42, %v1839_v59  ;;  %v1904_v60 = vrot.slane %v1817_v46, %v1829_v51 }
  0xbb   : > { %v345_v4 = vmul.f32 %v340_v57, %v335_v3  ;;  %v346_v9 = vmul.f32 %v344_v58, %v335_v3 }
  0xbc   : > { %v331_v15 = vadd.f32 %v329_v63, %v315_v61  ;;  %v332_v16 = vadd.f32 %v330_v2, %v316_v62  ;;  %v1913_v63 = vrot.slane %v1784_v37, %v1839_v59 }
  0xbe   : > { %v347_v19 = vadd.f32 %v345_v4, %v331_v15  ;;  %v348_v20 = vadd.f32 %v346_v9, %v332_v16  ;;  %v367_v21 = vpop.permute.xlu0 %366  ;;  %v1921_v4 = vrot.slane %v1817_v46, %v1839_v59 }
  0xbf   : > { %v381_v23 = vmul.f32 %v1845_v11, %v367_v21  ;;  %v383_v24 = vmul.f32 %v1849_v13, %v367_v21  ;;  %v351_v25 = vpop.permute.xlu1 %350  ;;  %v382_v30 = vmul.f32 %v1855_v22, %v367_v21 }
  0xc0   : > { %v361_v26 = vmul.f32 %v356_v17, %v351_v25  ;;  %v362_v27 = vmul.f32 %v360_v18, %v351_v25 }
  0xc1   : > { %387 = vrot.lane.b32.xlu1 %v381_v23, %s1584_s7  ;;  %391 = vrot.lane.b32.xlu0 %v383_v24, %s1584_s7 }
  0xc2   : > { %v1861_v28 = vadd.f32 %v361_v26, %v347_v19  ;;  %v1863_v29 = vadd.f32 %v362_v27, %v348_v20 }
  0xc3   : > { %v1916_v3 = vpop.permute.xlu0 %522 }
  0xc4   : > { %v402_v34 = vpop.permute.xlu1 %401 }
  0xc5   : > { %389 = vrot.lane.b32.xlu1 %v382_v30, %s1584_s7  ;;  %v416_v39 = vmul.f32 %v1868_v31, %v402_v34  ;;  %v417_v47 = vmul.f32 %v1874_v44, %v402_v34  ;;  %v418_v52 = vmul.f32 %v1878_v45, %v402_v34 }
  0xc7   : > { %422 = vrot.lane.b32.xlu0 %v416_v39, %s1584_s7 }
  0xc8   : > { %v1927_v16 = vpop.permute.xlu0 %570 }
  0xc9   : > { %v436_v50 = vpop.permute.xlu1 %435  ;;  %424 = vrot.lane.b32.xlu1 %v417_v47, %s1584_s7 }
  0xca   : > { %v451_v53 = vmul.f32 %v1884_v49, %v436_v50  ;;  %v450_v55 = vmul.f32 %v1892_v54, %v436_v50  ;;  %v452_v61 = vmul.f32 %v1904_v60, %v436_v50 }
  0xcb   : > { %426 = vrot.lane.b32.xlu0 %v418_v52, %s1584_s7 }
  0xcd   : > { %458 = vrot.lane.b32.xlu1 %v451_v53, %s1584_s7  ;;  %v1933_v19 = vpop.permute.xlu0 %615 }
  0xce   : > { %v470_v57 = vpop.permute.xlu1 %469 }
  0xcf   : > { %456 = vrot.lane.b32.xlu0 %v450_v55, %s1584_s7  ;;  %v485_v58 = vmul.f32 %v1898_v56, %v470_v57  ;;  %v484_v2 = vmul.f32 %v1913_v63, %v470_v57  ;;  %v486_v15 = vmul.f32 %v1921_v4, %v470_v57 }
  0xd1   : > { %492 = vrot.lane.b32.xlu1 %v485_v58, %s1584_s7 }
  0xd2   : > { %v687_v24 = vpop.permute.xlu0 %686 }
  0xd3   : > { %v1908_v62 = vpop.permute.xlu1 %538  ;;  %460 = vrot.lane.b32.xlu0 %v452_v61, %s1584_s7  ;;  %v689_v25 = vmul.f32 %v687_v24, %v1868_v31  ;;  %v690_v30 = vmul.f32 %v687_v24, %v1874_v44  ;;  %v691_v34 = vmul.f32 %v687_v24, %v1878_v45  ;;  %v1586_v61 = vmov 23  }
  0xd7   : > { %490 = vrot.lane.b32.xlu0 %v484_v2, %s1584_s7  ;;  %v1588_v2 = vmov 24  }
  0xd8   : > { %v1923_v9 = vpop.permute.xlu1 %554 }
  0xdb   : > { %494 = vrot.lane.b32.xlu0 %v486_v15, %s1584_s7  ;;  %v1589_v15 = vmov 26   ;;  %s1233_s7 = scalar_lea.hbm %s2229_s5, %s1321_s16 }
  0xdd   : > { %v1929_v17 = vpop.permute.xlu1 %599 }
  0xe2   : > { %v1931_v18 = vpop.permute.xlu1 %631 }
  0xe7   : > { %v664_v20 = vpop.permute.xlu1 %663 }
  0xe8   : > { %v666_v21 = vmul.f32 %v664_v20, %v1845_v11  ;;  %v667_v23 = vmul.f32 %v664_v20, %v1855_v22  ;;  %v668_v26 = vmul.f32 %v664_v20, %v1849_v13 }
  0xea   : > { %674 = vrot.lane.b32.xlu0 %v667_v23, %s1585_s9  ;;  %672 = vrot.lane.b32.xlu1 %v666_v21, %s1585_s9  ;;  %v1957_v21 = vpop.permute.xlu0 %647  ;;  %v1590_v23 = vmov 25  }
  0xec   : > { %v709_v27 = vpop.permute.xlu1 %708 }
  0xed   : > { %v711_v39 = vmul.f32 %v709_v27, %v1892_v54  ;;  %v712_v47 = vmul.f32 %v709_v27, %v1884_v49  ;;  %v713_v52 = vmul.f32 %v709_v27, %v1904_v60 }
  0xee   : > { %676 = vrot.lane.b32.xlu1 %v668_v26, %s1585_s9  ;;  %695 = vrot.lane.b32.xlu0 %v689_v25, %s1585_s9  ;;  %v930_v26 = vpop.permute.xlu0 %929 }
  0xf1   : > { %v731_v50 = vpop.permute.xlu1 %730 }
  0xf2   : > { %697 = vrot.lane.b32.xlu1 %v690_v30, %s1585_s9  ;;  %699 = vrot.lane.b32.xlu0 %v691_v34, %s1585_s9  ;;  %v733_v53 = vmul.f32 %v731_v50, %v1913_v63  ;;  %v734_v55 = vmul.f32 %v731_v50, %v1898_v56  ;;  %v735_v57 = vmul.f32 %v731_v50, %v1921_v4  ;;  %v1592_v30 = vmov 33  }
  0xf3   : > { %v932_v34 = vmul.f32 %v930_v26, %v1868_v31 }
  0xf6   : > { %717 = vrot.lane.b32.xlu1 %v711_v39, %s1585_s9  ;;  %719 = vrot.lane.b32.xlu0 %v712_v47, %s1585_s9  ;;  %v907_v58 = vpop.permute.xlu1 %906  ;;  %v1593_v39 = vmov 27   ;;  %v934_v47 = vmul.f32 %v930_v26, %v1878_v45 }
  0xf7   : > { %v910_v25 = vmul.f32 %v907_v58, %v1855_v22  ;;  %v909_v22 = vmul.f32 %v907_v58, %v1845_v11  ;;  %v911_v31 = vmul.f32 %v907_v58, %v1849_v13  ;;  %v933_v13 = vmul.f32 %v930_v26, %v1874_v44 }
  0xf8   : > { %v1596_v26 = vmov 34  }
  0xfa   : > { %721 = vrot.lane.b32.xlu1 %v713_v52, %s1585_s9  ;;  %739 = vrot.lane.b32.xlu0 %v733_v53, %s1585_s9  ;;  %v1594_v52 = vmov 32  }
  0xfb   : > { %v1953_v20 = vpop.permute.xlu1 %951 }
  0xfc   : > { %v955_v58 = vmul.f32 %v1953_v20, %v1884_v49 }
  0xfe   : > { %741 = vrot.lane.b32.xlu1 %v734_v55, %s1585_s9  ;;  %743 = vrot.lane.b32.xlu0 %v735_v57, %s1585_s9  ;;  %s1221_s9 = scalar_lea.sflag [#allocation4], %s1727_s13 }
 0x100   : > { %v1960_v24 = vpop.permute.xlu1 %973 }
 0x102   : > { %781 = vperm.xlu1 %1438, %v1743_v5   ;;  %755 = vrot.lane.b32.xlu0 %v1817_v46, %s1583_s8 }
 0x105   : > { %v1966_v27 = vpop.permute.xlu1 %765 }
 0x106   : > { %1440 = vset.pattern.permute.xlu1 %v1586_v61  ;;  %797 = vperm.xlu0 %1439, %v1743_v5  }
 0x107   : > { %813 = vperm.xlu1 %1440, %v1743_v5  }
 0x10a   : > { %828 = vrot.lane.b32.xlu0 %v1784_v37, %s1587_s10 }
 0x10b   : > { %1441 = vset.pattern.permute.xlu1 %v1588_v2  ;;  %1443 = vset.pattern.permute.xlu0 %v1589_v15 }
 0x10c   : > { %842 = vperm.xlu1 %1441, %v1743_v5  }
 0x10e   : > { %832 = vrot.lane.b32.xlu0 %v1817_v46, %s1587_s10 }
 0x110   : > { %830 = vrot.lane.b32.xlu1 %v1802_v42, %s1587_s10  ;;  %s1486_s10 = scalar_lea.vmem %s1236_s29, 64 }
 0x111   : > { %1442 = vset.pattern.permute.xlu1 %v1590_v23  ;;  %p1487_p11 = scmp.ne.s32.totalorder %s1236_s29, %s1486_s10 }
 0x112   : > { %874 = vperm.xlu0 %1443, %v1743_v5  }
 0x113   : > { %p1488_p13 = pnand %p1487_p11, %p2248_p12 }
 0x114   : > { %858 = vperm.xlu1 %1442, %v1743_v5  }
 0x115   : > { %p1489_p1 = pneg %p1488_p13 }
 0x116   : > { %917 = vrot.lane.b32.xlu0 %v910_v25, %s1591_s11 }
 0x117   : > { %1446 = vset.pattern.permute.xlu0 %v1592_v30  ;;  %v954_v30 = vmul.f32 %v1953_v20, %v1892_v54  ;;  %v976_v54 = vmul.f32 %v1960_v24, %v1913_v63 }
 0x118   : > { %1444 = vset.pattern.permute.xlu1 %v1593_v39 }
 0x119   : > { %890 = vperm.xlu1 %1444, %v1743_v5  }
 0x11a   : > { %938 = vrot.lane.b32.xlu0 %v932_v34, %s1591_s11  ;;  %v978_v34 = vmul.f32 %v1960_v24, %v1921_v4  ;;  %v2029_v4 = vld [vmem:[%s2227_s3] sm:$0x3] }
 0x11c   : > { %v509_v50 = vpop.permute.xlu1 %508 }
 0x11d   : > { %915 = vrot.lane.b32.xlu1 %v909_v22, %s1591_s11  ;;  %v1597_v22 = vmov 35  }
 0x11e   : > { %942 = vrot.lane.b32.xlu0 %v934_v47, %s1591_s11  ;;  %1445 = vset.pattern.permute.xlu1 %v1594_v52 }
 0x120   : > { %v586_v55 = vpop.permute.xlu1 %585  ;;  %v511_v11 = vpop.permute.xlu0 %510 }
 0x121   : > { %v515_v45 = vsel %vm514_vm3, %v509_v50, %v511_v11  ;;  %919 = vrot.lane.b32.xlu1 %v911_v31, %s1591_s11 }
 0x122   : > { %v1986_v57 = vsel %vm1978_vm4, %v515_v45, 0.0  ;;  %994 = vrot.lane.b32.xlu0 %v1784_v37, %s1595_s17 }
 0x124   : > { %v752_v32 = vpop.permute.xlu1 %751  ;;  %v590_v35 = vpop.permute.xlu0 %589 }
 0x125   : > { %940 = vrot.lane.b32.xlu1 %v933_v13, %s1591_s11 }
 0x126   : > { %998 = vrot.lane.b32.xlu0 %v1817_v46, %s1595_s17 }
 0x128   : > { %v513_v61 = vpop.permute.xlu1 %512  ;;  %v1994_v2 = vpop.permute.xlu0 %753 }
 0x129   : > { %1008 = vperm.xlu1 %1445, %v1743_v5   ;;  %v758_v37 = vsel %vm757_vm5, %v752_v32, %v1994_v2 }
 0x12a   : > { %962 = vrot.lane.b32.xlu0 %v955_v58, %s1591_s11  ;;  %v2002_v44 = vsel %vm1978_vm4, %v758_v37, 0.0 }
 0x12c   : > { %v588_v46 = vpop.permute.xlu1 %587 }
 0x12d   : > { %v592_v15 = vsel %vm591_vm6, %v586_v55, %v588_v46  ;;  %v593_v23 = vsel %vm591_vm6, %v588_v46, %v590_v35  ;;  %996 = vrot.lane.b32.xlu1 %v1802_v42, %s1595_s17  ;;  %v956_v42 = vmul.f32 %v1953_v20, %v1904_v60  ;;  %v977_v20 = vmul.f32 %v1960_v24, %v1898_v56 }
 0x12e   : > { %v2007_v49 = vsel %vm1791_vm1, %v592_v15, 0.0  ;;  %v2011_v25 = vsel %vm1797_vm2, %v593_v23, 0.0  ;;  %1024 = vperm.xlu0 %1446, %v1743_v5   ;;  %1447 = vset.pattern.permute.xlu1 %v1596_v26  ;;  %v560_v46 = vrot.slane %v1986_v57, %v1829_v51 }
 0x131   : > { %960 = vrot.lane.b32.xlu1 %v954_v30, %s1591_s11 }
 0x132   : > { %986 = vrot.lane.b32.xlu0 %v978_v34, %s1591_s11 }
 0x133   : > { %v388_v39 = vpop.permute.xlu1 %387  ;;  %1448 = vset.pattern.permute.xlu0 %v1597_v22  ;;  %v392_v47 = vpop.permute.xlu0 %391 }
 0x135   : > { %964 = vrot.lane.b32.xlu1 %v956_v42, %s1591_s11 }
 0x136   : > { %1056 = vperm.xlu0 %1448, %v1743_v5  }
 0x137   : > { %v390_v50 = vpop.permute.xlu1 %389 }
 0x138   : > { %v394_v55 = vsel %vm393_vm7, %v388_v39, %v390_v50  ;;  %v395_v13 = vsel %vm393_vm7, %v390_v50, %v392_v47 }
 0x139   : > { %982 = vrot.lane.b32.xlu1 %v976_v54, %s1591_s11  ;;  %v423_v60 = vpop.permute.xlu0 %422  ;;  %v398_v24 = vadd.f32 %v394_v55, %v1861_v28  ;;  %v399_v35 = vadd.f32 %v395_v13, %v1863_v29  ;;  %v576_v29 = vrot.slane %v1986_v57, %v1839_v59 }
 0x13a   : > { %1450 = vset.pattern.permute.xlu0 %v1554_v1 }
 0x13b   : > { %1097 = vperm.xlu0 %1450, %v2029_v4   ;;  %v425_v52 = vpop.permute.xlu1 %424 }
 0x13c   : > { %v428_v45 = vsel %vm393_vm7, %v423_v60, %v425_v52  ;;  %v565_v60 = vmul.f32 %v560_v46, %v1923_v9 }
 0x13d   : > { %984 = vrot.lane.b32.xlu1 %v977_v20, %s1591_s11  ;;  %v427_v63 = vpop.permute.xlu0 %426  ;;  %v432_v33 = vadd.f32 %v428_v45, %v398_v24  ;;  %s1598_s11 = smov [#allocation5]  }
 0x13e   : > { %v429_v28 = vsel %vm393_vm7, %v425_v52, %v427_v63  ;;  %v605_v63 = vrot.slane %v2007_v49, %v1808_v43  ;;  %s1490_s17 = sshll.u32 %s1598_s11, 4  ;;  %s1491_s17 = int_to_ptr.vmem [resolvable:$false] %s1490_s17 }
 0x13f   : > { %1453 = vset.pattern.permute.xlu0 %v1557_v7  ;;  %v459_v1 = vpop.permute.xlu1 %458  ;;  %v516_v7 = vsel %vm514_vm3, %v511_v11, %v513_v61  ;;  %v544_v11 = vrot.slane %v1986_v57, %v1820_v48  ;;  %v433_v30 = vadd.f32 %v429_v28, %v399_v35  ;;  %v625_v28 = vrot.slane %v2011_v25, %v1820_v48  ;;  %s1492_s22 = scalar_lea.vmem %s1491_s17, 128  ;;  %p1493_p3 = scmp.lt.s32.totalorder %s1236_s29, %s1491_s17 }
 0x140   : > { %1145 = vperm.xlu0 %1453, %v2029_v4   ;;  %p1494_p5 = scmp.lt.s32.totalorder %s1492_s22, %s1486_s10 }
 0x141   : > { %1040 = vperm.xlu1 %1447, %v1743_v5   ;;  %v457_v31 = vpop.permute.xlu0 %456  ;;  %v549_v47 = vmul.f32 %v544_v11, %v1908_v62  ;;  %v627_v46 = vmul.f32 %v625_v28, %v1933_v19 }
 0x142   : > { %v462_v32 = vsel %vm393_vm7, %v457_v31, %v459_v1  ;;  %p1495_p8 = por %p1494_p5, %p1493_p3 }
 0x143   : > { %v466_v58 = vadd.f32 %v462_v32, %v432_v33  ;;  %v493_v61 = vpop.permute.xlu1 %492  ;;  %v637_v32 = vrot.slane %v2007_v49, %v1829_v51 }
 0x144   : > { %1456 = vset.pattern.permute.xlu0 %v1564_v14  ;;  %v528_v14 = vrot.slane %v1986_v57, %v1808_v43  ;;  %p1496_p10 = pnand %p1495_p8, %p1489_p1 }
 0x145   : > { %1449 = vset.pattern.permute.xlu1 %v1553_v0  ;;  %v461_v5 = vpop.permute.xlu0 %460  ;;  %1193 = vperm.xlu0 %1456, %v2029_v4   ;;  %v520_v0 = vsel %vm2045_vm8, %v516_v7, 0.0  ;;  %v621_v7 = vrot.slane %v2007_v49, %v1820_v48 }
 0x146   : > { %1081 = vperm.xlu1 %1449, %v2029_v4   ;;  %v463_v15 = vsel %vm393_vm7, %v459_v1, %v461_v5  ;;  %v532_v26 = vrot.slane %v520_v0, %v1808_v43  ;;  %v533_v34 = vmul.f32 %v528_v14, %v1916_v3  ;;  %v548_v39 = vrot.slane %v520_v0, %v1820_v48 }
 0x147   : > { %v467_v22 = vadd.f32 %v463_v15, %v433_v30  ;;  %v564_v20 = vrot.slane %v520_v0, %v1829_v51  ;;  %v581_v1 = vmul.f32 %v576_v29, %v1927_v16  ;;  %v580_v45 = vrot.slane %v520_v0, %v1839_v59 }
 0x148   : > { %v534_v57 = vmul.f32 %v532_v26, %v1916_v3  ;;  %v550_v5 = vmul.f32 %v548_v39, %v1908_v62  ;;  %v610_v3 = vmul.f32 %v605_v63, %v1929_v17  ;;  %v609_v14 = vrot.slane %v2011_v25, %v1808_v43 }
 0x149   : > { %v491_v37 = vpop.permute.xlu0 %490  ;;  %v566_v13 = vmul.f32 %v564_v20, %v1923_v9  ;;  %v582_v0 = vmul.f32 %v580_v45, %v1927_v16  ;;  %v653_v62 = vrot.slane %v2007_v49, %v1839_v59  ;;  %v626_v9 = vmul.f32 %v621_v7, %v1933_v19 }
 0x14a   : > { %v496_v23 = vsel %vm393_vm7, %v491_v37, %v493_v61  ;;  %1076 = vperm.xlu1 %1449, %v1073_v36   ;;  %v642_v16 = vmul.f32 %v637_v32, %v1931_v18  ;;  %v657_v49 = vrot.slane %v2011_v25, %v1839_v59 }
 0x14b   : > { %v500_v42 = vadd.f32 %v496_v23, %v466_v58  ;;  %v641_v58 = vrot.slane %v2011_v25, %v1829_v51  ;;  %v658_v23 = vmul.f32 %v653_v62, %v1957_v21 }
 0x14c   : > { %v659_v25 = vmul.f32 %v657_v49, %v1957_v21  ;;  %v771_v21 = vrot.slane %v2002_v44, %v1808_v43 }
 0x14d   : > { %v535_v54 = vadd.f32 %v533_v34, %v500_v42  ;;  %v495_v50 = vpop.permute.xlu0 %494 }
 0x14e   : > { %v497_v52 = vsel %vm393_vm7, %v493_v61, %v495_v50  ;;  %1451 = vset.pattern.permute.xlu1 %v1556_v6  ;;  %v611_v61 = vmul.f32 %v609_v14, %v1929_v17  ;;  %v643_v17 = vmul.f32 %v641_v58, %v1931_v18 }
 0x14f   : > { %v551_v31 = vadd.f32 %v549_v47, %v535_v54  ;;  %v501_v55 = vadd.f32 %v497_v52, %v467_v22  ;;  %1113 = vperm.xlu1 %1451, %v2029_v4  }
 0x151   : > { %v567_v24 = vadd.f32 %v565_v60, %v551_v31  ;;  %v536_v6 = vadd.f32 %v534_v57, %v501_v55 }
 0x153   : > { %v583_v33 = vadd.f32 %v581_v1, %v567_v24  ;;  %v552_v36 = vadd.f32 %v550_v5, %v536_v6  ;;  %1452 = vset.pattern.permute.xlu1 %v1558_v8  ;;  %v776_v6 = vmul.f32 %v771_v21, %v1966_v27 }
 0x154   : > { %1129 = vperm.xlu1 %1452, %v2029_v4  }
 0x155   : > { %v568_v11 = vadd.f32 %v566_v13, %v552_v36  ;;  %v612_v35 = vadd.f32 %v610_v3, %v583_v33 }
 0x157   : > { %v584_v8 = vadd.f32 %v582_v0, %v568_v11  ;;  %v628_v37 = vadd.f32 %v626_v9, %v612_v35 }
 0x158   : > { %1454 = vset.pattern.permute.xlu1 %v1560_v10 }
 0x159   : > { %1161 = vperm.xlu1 %1454, %v2029_v4   ;;  %v644_v15 = vadd.f32 %v642_v16, %v628_v37  ;;  %v613_v26 = vadd.f32 %v611_v61, %v584_v8  ;;  %v787_v61 = vrot.slane %v2002_v44, %v1820_v48 }
 0x15b   : > { %v660_v30 = vadd.f32 %v658_v23, %v644_v15  ;;  %v629_v34 = vadd.f32 %v627_v46, %v613_v26  ;;  %v803_v15 = vrot.slane %v2002_v44, %v1829_v51 }
 0x15c   : > { %v673_v42 = vpop.permute.xlu1 %672  ;;  %v675_v29 = vpop.permute.xlu0 %674 }
 0x15d   : > { %1455 = vset.pattern.permute.xlu1 %v1562_v12  ;;  %v645_v39 = vadd.f32 %v643_v17, %v629_v34  ;;  %v679_v20 = vsel %vm678_vm9, %v673_v42, %v675_v29 }
 0x15e   : > { %1177 = vperm.xlu1 %1455, %v2029_v4   ;;  %v683_v52 = vadd.f32 %v679_v20, %v660_v30 }
 0x15f   : > { %v661_v10 = vadd.f32 %v659_v25, %v645_v39 }
 0x160   : > { %v677_v19 = vpop.permute.xlu1 %676  ;;  %v696_v22 = vpop.permute.xlu0 %695 }
 0x161   : > { %v680_v57 = vsel %vm678_vm9, %v675_v29, %v677_v19 }
 0x162   : > { %v684_v13 = vadd.f32 %v680_v57, %v661_v10 }
 0x164   : > { %v698_v47 = vpop.permute.xlu1 %697  ;;  %v700_v54 = vpop.permute.xlu0 %699 }
 0x165   : > { %v701_v18 = vsel %vm678_vm9, %v696_v22, %v698_v47  ;;  %v702_v24 = vsel %vm678_vm9, %v698_v47, %v700_v54 }
 0x166   : > { %v705_v4 = vadd.f32 %v701_v18, %v683_v52  ;;  %v706_v33 = vadd.f32 %v702_v24, %v684_v13 }
 0x168   : > { %v718_v50 = vpop.permute.xlu1 %717  ;;  %v720_v60 = vpop.permute.xlu0 %719 }
 0x169   : > { %v723_v31 = vsel %vm678_vm9, %v718_v50, %v720_v60 }
 0x16a   : > { %v727_v55 = vadd.f32 %v723_v31, %v705_v4 }
 0x16c   : > { %v722_v63 = vpop.permute.xlu1 %721  ;;  %v740_v12 = vpop.permute.xlu0 %739 }
 0x16d   : > { %v724_v32 = vsel %vm678_vm9, %v720_v60, %v722_v63 }
 0x16e   : > { %v728_v9 = vadd.f32 %v724_v32, %v706_v33 }
 0x170   : > { %v742_v1 = vpop.permute.xlu1 %741  ;;  %v744_v45 = vpop.permute.xlu0 %743 }
 0x171   : > { %v745_v7 = vsel %vm678_vm9, %v740_v12, %v742_v1  ;;  %v746_v0 = vsel %vm678_vm9, %v742_v1, %v744_v45 }
 0x172   : > { %v749_v5 = vadd.f32 %v745_v7, %v727_v55  ;;  %v750_v11 = vadd.f32 %v746_v0, %v728_v9 }
 0x174   : > { %v778_v3 = vadd.f32 %v776_v6, %v749_v5  ;;  %v756_v14 = vpop.permute.xlu0 %755 }
 0x175   : > { %v759_v36 = vsel %vm757_vm5, %v1994_v2, %v756_v14 }
 0x176   : > { %v763_v62 = vsel %vm2045_vm8, %v759_v36, 0.0 }
 0x177   : > { %v775_v28 = vrot.slane %v763_v62, %v1808_v43  ;;  %v791_v8 = vrot.slane %v763_v62, %v1820_v48  ;;  %v807_v23 = vrot.slane %v763_v62, %v1829_v51  ;;  %v823_v30 = vrot.slane %v763_v62, %v1839_v59 }
 0x179   : > { %v777_v35 = vmul.f32 %v775_v28, %v1966_v27  ;;  %v819_v27 = vrot.slane %v2002_v44, %v1839_v59 }
 0x17b   : > { %v779_v58 = vadd.f32 %v777_v35, %v750_v11 }
 0x17d   : > { %v782_v37 = vpop.permute.xlu1 %781 }
 0x17e   : > { %v792_v16 = vmul.f32 %v787_v61, %v782_v37  ;;  %v793_v2 = vmul.f32 %v791_v8, %v782_v37 }
 0x180   : > { %v794_v49 = vadd.f32 %v792_v16, %v778_v3  ;;  %v795_v46 = vadd.f32 %v793_v2, %v779_v58 }
 0x181   : > { %v798_v26 = vpop.permute.xlu0 %797 }
 0x182   : > { %v808_v34 = vmul.f32 %v803_v15, %v798_v26  ;;  %v809_v17 = vmul.f32 %v807_v23, %v798_v26  ;;  %v814_v42 = vpop.permute.xlu1 %813 }
 0x183   : > { %v824_v29 = vmul.f32 %v819_v27, %v814_v42  ;;  %v825_v39 = vmul.f32 %v823_v30, %v814_v42 }
 0x184   : > { %v810_v25 = vadd.f32 %v808_v34, %v794_v49  ;;  %v811_v10 = vadd.f32 %v809_v17, %v795_v46 }
 0x185   : > { %v829_v19 = vpop.permute.xlu0 %828 }
 0x186   : > { %v826_v22 = vadd.f32 %v824_v29, %v810_v25  ;;  %v827_v47 = vadd.f32 %v825_v39, %v811_v10 }
 0x187   : > { %v843_v54 = vpop.permute.xlu1 %842 }
 0x189   : > { %v833_v50 = vpop.permute.xlu0 %832 }
 0x18b   : > { %v831_v60 = vpop.permute.xlu1 %830 }
 0x18c   : > { %v835_v20 = vsel %vm834_vm10, %v829_v19, %v831_v60  ;;  %v836_v18 = vsel %vm834_vm10, %v831_v60, %v833_v50 }
 0x18d   : > { %v839_v44 = vsel %vm1791_vm1, %v835_v20, 0.0  ;;  %v840_v52 = vsel %vm1797_vm2, %v836_v18, 0.0  ;;  %v875_v63 = vpop.permute.xlu0 %874 }
 0x18e   : > { %v848_v12 = vrot.slane %v839_v44, %v1808_v43  ;;  %v852_v31 = vrot.slane %v840_v52, %v1808_v43  ;;  %v864_v4 = vrot.slane %v839_v44, %v1820_v48  ;;  %v868_v57 = vrot.slane %v840_v52, %v1820_v48 }
 0x18f   : > { %v859_v21 = vpop.permute.xlu1 %858  ;;  %v880_v55 = vrot.slane %v839_v44, %v1829_v51  ;;  %v884_v1 = vrot.slane %v840_v52, %v1829_v51  ;;  %v896_v13 = vrot.slane %v839_v44, %v1839_v59  ;;  %v900_v32 = vrot.slane %v840_v52, %v1839_v59 }
 0x190   : > { %v853_v45 = vmul.f32 %v848_v12, %v843_v54  ;;  %v854_v40 = vmul.f32 %v852_v31, %v843_v54  ;;  %v869_v5 = vmul.f32 %v864_v4, %v859_v21  ;;  %v870_v6 = vmul.f32 %v868_v57, %v859_v21 }
 0x191   : > { %v918_v7 = vpop.permute.xlu0 %917  ;;  %v885_v3 = vmul.f32 %v880_v55, %v875_v63  ;;  %v886_v14 = vmul.f32 %v884_v1, %v875_v63 }
 0x192   : > { %v855_v24 = vadd.f32 %v853_v45, %v826_v22  ;;  %v856_v41 = vadd.f32 %v854_v40, %v827_v47 }
 0x194   : > { %v871_v33 = vadd.f32 %v869_v5, %v855_v24  ;;  %v872_v36 = vadd.f32 %v870_v6, %v856_v41  ;;  %v891_v0 = vpop.permute.xlu1 %890 }
 0x195   : > { %v901_v62 = vmul.f32 %v896_v13, %v891_v0  ;;  %v902_v9 = vmul.f32 %v900_v32, %v891_v0  ;;  %v939_v28 = vpop.permute.xlu0 %938 }
 0x196   : > { %v887_v11 = vadd.f32 %v885_v3, %v871_v33  ;;  %v888_v35 = vadd.f32 %v886_v14, %v872_v36 }
 0x198   : > { %v903_v58 = vadd.f32 %v901_v62, %v887_v11  ;;  %v904_v61 = vadd.f32 %v902_v9, %v888_v35  ;;  %v916_v8 = vpop.permute.xlu1 %915 }
 0x199   : > { %v943_v37 = vpop.permute.xlu0 %942  ;;  %v922_v42 = vsel %vm921_vm12, %v916_v8, %v918_v7 }
 0x19a   : > { %v926_v47 = vadd.f32 %v922_v42, %v903_v58 }
 0x19c   : > { %v920_v16 = vpop.permute.xlu1 %919 }
 0x19d   : > { %v995_v2 = vpop.permute.xlu0 %994  ;;  %v923_v29 = vsel %vm921_vm12, %v918_v7, %v920_v16 }
 0x19e   : > { %v927_v54 = vadd.f32 %v923_v29, %v904_v61 }
 0x1a0   : > { %v941_v49 = vpop.permute.xlu1 %940 }
 0x1a1   : > { %v999_v15 = vpop.permute.xlu0 %998  ;;  %v944_v25 = vsel %vm921_vm12, %v939_v28, %v941_v49  ;;  %v945_v10 = vsel %vm921_vm12, %v941_v49, %v943_v37 }
 0x1a2   : > { %v948_v18 = vadd.f32 %v944_v25, %v926_v47  ;;  %v949_v44 = vadd.f32 %v945_v10, %v927_v54  ;;  %v1150_v47 = vsub.s32 4, %v1787_v38 }
 0x1a4   : > { %v1009_v46 = vpop.permute.xlu1 %1008 }
 0x1a5   : > { %v963_v26 = vpop.permute.xlu0 %962 }
 0x1a8   : > { %v997_v23 = vpop.permute.xlu1 %996 }
 0x1a9   : > { %v1001_v30 = vsel %vm1000_vm11, %v995_v2, %v997_v23  ;;  %v1002_v34 = vsel %vm1000_vm11, %v997_v23, %v999_v15  ;;  %v1025_v39 = vpop.permute.xlu0 %1024 }
 0x1aa   : > { %v1005_v19 = vsel %vm1978_vm4, %v1001_v30, 0.0  ;;  %v1006_v22 = vsel %vm2045_vm8, %v1002_v34, 0.0 }
 0x1ab   : > { %v1014_v52 = vrot.slane %v1005_v19, %v1808_v43  ;;  %v1018_v63 = vrot.slane %v1006_v22, %v1808_v43  ;;  %v1030_v53 = vrot.slane %v1005_v19, %v1820_v48  ;;  %v1034_v31 = vrot.slane %v1006_v22, %v1820_v48 }
 0x1ac   : > { %v961_v27 = vpop.permute.xlu1 %960  ;;  %v1046_v24 = vrot.slane %v1005_v19, %v1829_v51  ;;  %v1050_v41 = vrot.slane %v1006_v22, %v1829_v51  ;;  %v1062_v0 = vrot.slane %v1005_v19, %v1839_v59  ;;  %v1066_v62 = vrot.slane %v1006_v22, %v1839_v59 }
 0x1ad   : > { %v966_v60 = vsel %vm921_vm12, %v961_v27, %v963_v26  ;;  %v987_v12 = vpop.permute.xlu0 %986  ;;  %v1019_v40 = vmul.f32 %v1014_v52, %v1009_v46  ;;  %v1020_v7 = vmul.f32 %v1018_v63, %v1009_v46  ;;  %v1035_v5 = vmul.f32 %v1030_v53, %v1025_v39 }
 0x1ae   : > { %v970_v56 = vadd.f32 %v966_v60, %v948_v18  ;;  %v1036_v6 = vmul.f32 %v1034_v31, %v1025_v39  ;;  %v1166_v63 = vsub.s32 5, %v1787_v38 }
 0x1b0   : > { %v965_v17 = vpop.permute.xlu1 %964 }
 0x1b1   : > { %v967_v20 = vsel %vm921_vm12, %v963_v26, %v965_v17  ;;  %v1057_v14 = vpop.permute.xlu0 %1056 }
 0x1b2   : > { %v971_v21 = vadd.f32 %v967_v20, %v949_v44  ;;  %v1067_v11 = vmul.f32 %v1062_v0, %v1057_v14  ;;  %v1068_v35 = vmul.f32 %v1066_v62, %v1057_v14 }
 0x1b4   : > { %v983_v50 = vpop.permute.xlu1 %982 }
 0x1b6   : > { %v1098_v30 = vpop.permute.xlu0 %1097 }
 0x1b8   : > { %v985_v4 = vpop.permute.xlu1 %984 }
 0x1b9   : > { %v988_v57 = vsel %vm921_vm12, %v983_v50, %v985_v4  ;;  %v989_v55 = vsel %vm921_vm12, %v985_v4, %v987_v12 }
 0x1ba   : > { %v992_v1 = vadd.f32 %v988_v57, %v970_v56  ;;  %v993_v45 = vadd.f32 %v989_v55, %v971_v21  ;;  %v1198_v57 = vsub.s32 7, %v1787_v38  ;;  %v1182_v55 = vsub.s32 6, %v1787_v38 }
 0x1bb   : > { %v1146_v4 = vpop.permute.xlu0 %1145 }
 0x1bc   : > { %v1021_v13 = vadd.f32 %v1019_v40, %v992_v1  ;;  %v1022_v32 = vadd.f32 %v1020_v7, %v993_v45  ;;  %v1041_v3 = vpop.permute.xlu1 %1040 }
 0x1bd   : > { %v1051_v33 = vmul.f32 %v1046_v24, %v1041_v3  ;;  %v1052_v36 = vmul.f32 %v1050_v41, %v1041_v3 }
 0x1be   : > { %v1037_v9 = vadd.f32 %v1035_v5, %v1021_v13  ;;  %v1038_v28 = vadd.f32 %v1036_v6, %v1022_v32 }
 0x1c0   : > { %v1053_v58 = vadd.f32 %v1051_v33, %v1037_v9  ;;  %v1054_v61 = vadd.f32 %v1052_v36, %v1038_v28  ;;  %v1194_v33 = vpop.permute.xlu0 %1193 }
 0x1c1   : > { %v1082_v8 = vpop.permute.xlu1 %1081 }
 0x1c2   : > { %v1069_v37 = vadd.f32 %v1067_v11, %v1053_v58  ;;  %v1070_v16 = vadd.f32 %v1068_v35, %v1054_v61 }
 0x1c4   : > { %v1071_v2 = vmax.f32 %v1069_v37, 0.0  ;;  %v1072_v49 = vmax.f32 %v1070_v16, 0.0 }
 0x1c5   : > { %v1077_v46 = vpop.permute.xlu1 %1076 }
 0x1c6   : > { %v1103_v15 = vrot.slane %v1071_v2, %v1820_v48  ;;  %v1107_v23 = vrot.slane %v1072_v49, %v1820_v48  ;;  %v1087_v26 = vrot.slane %v1071_v2, %v1808_v43  ;;  %v1091_v27 = vrot.slane %v1072_v49, %v1808_v43 }
 0x1c7   : > { %v1119_v19 = vrot.slane %v1071_v2, %v1829_v51  ;;  %v1123_v22 = vrot.slane %v1072_v49, %v1829_v51  ;;  %v1135_v43 = vrot.slane %v1071_v2, %v1839_v59  ;;  %v1139_v20 = vrot.slane %v1072_v49, %v1839_v59 }
 0x1c8   : > { %v1092_v34 = vmul.f32 %v1087_v26, %v1082_v8  ;;  %v1093_v17 = vmul.f32 %v1091_v27, %v1082_v8  ;;  %v1108_v42 = vmul.f32 %v1103_v15, %v1098_v30  ;;  %v1109_v29 = vmul.f32 %v1107_v23, %v1098_v30 }
 0x1c9   : > { %v1151_v18 = vrot.slane %v1071_v2, %v1150_v47  ;;  %v1155_v44 = vrot.slane %v1072_v49, %v1150_v47  ;;  %v1167_v40 = vrot.slane %v1071_v2, %v1166_v63  ;;  %v1171_v7 = vrot.slane %v1072_v49, %v1166_v63 }
 0x1ca   : > { %v1094_v39 = vadd.f32 %v1092_v34, %v1077_v46  ;;  %v1095_v25 = vadd.f32 %v1093_v17, %v1077_v46  ;;  %v1114_v10 = vpop.permute.xlu1 %1113  ;;  %v1199_v13 = vrot.slane %v1071_v2, %v1198_v57  ;;  %v1203_v32 = vrot.slane %v1072_v49, %v1198_v57 }
 0x1cb   : > { %v1124_v50 = vmul.f32 %v1119_v19, %v1114_v10  ;;  %v1125_v60 = vmul.f32 %v1123_v22, %v1114_v10  ;;  %v1156_v1 = vmul.f32 %v1151_v18, %v1146_v4  ;;  %v1157_v45 = vmul.f32 %v1155_v44, %v1146_v4 }
 0x1cc   : > { %v1110_v54 = vadd.f32 %v1108_v42, %v1094_v39  ;;  %v1111_v48 = vadd.f32 %v1109_v29, %v1095_v25  ;;  %v1183_v3 = vrot.slane %v1071_v2, %v1182_v55  ;;  %v1187_v14 = vrot.slane %v1072_v49, %v1182_v55 }
 0x1cd   : > { %v1204_v28 = vmul.f32 %v1199_v13, %v1194_v33  ;;  %v1205_v11 = vmul.f32 %v1203_v32, %v1194_v33 }
 0x1ce   : > { %v1126_v12 = vadd.f32 %v1124_v50, %v1110_v54  ;;  %v1127_v53 = vadd.f32 %v1125_v60, %v1111_v48 }
 0x1cf   : > { %v1130_v52 = vpop.permute.xlu1 %1129 }
 0x1d0   : > { %v1140_v31 = vmul.f32 %v1135_v43, %v1130_v52  ;;  %v1141_v51 = vmul.f32 %v1139_v20, %v1130_v52 }
 0x1d2   : > { %v1142_v56 = vadd.f32 %v1140_v31, %v1126_v12  ;;  %v1143_v21 = vadd.f32 %v1141_v51, %v1127_v53 }
 0x1d4   : > { %v1162_v59 = vpop.permute.xlu1 %1161  ;;  %v1158_v24 = vadd.f32 %v1156_v1, %v1142_v56  ;;  %v1159_v41 = vadd.f32 %v1157_v45, %v1143_v21 }
 0x1d5   : > { %v1172_v5 = vmul.f32 %v1167_v40, %v1162_v59  ;;  %v1173_v6 = vmul.f32 %v1171_v7, %v1162_v59 }
 0x1d7   : > { %v1174_v0 = vadd.f32 %v1172_v5, %v1158_v24  ;;  %v1175_v62 = vadd.f32 %v1173_v6, %v1159_v41 }
 0x1d9   : > { %v1178_v36 = vpop.permute.xlu1 %1177 }
 0x1da   : > { %v1188_v38 = vmul.f32 %v1183_v3, %v1178_v36  ;;  %v1189_v9 = vmul.f32 %v1187_v14, %v1178_v36 }
 0x1dc   : > { %v1190_v35 = vadd.f32 %v1188_v38, %v1174_v0  ;;  %v1191_v58 = vadd.f32 %v1189_v9, %v1175_v62 }
 0x1de   : > { %v1206_v61 = vadd.f32 %v1204_v28, %v1190_v35  ;;  %v1207_v8 = vadd.f32 %v1205_v11, %v1191_v58 }
 0x1e0   : > { %v1210_v37 = vcombine.low %v1206_v61, %v1207_v8 }
 0x1e2   : > { %1314 = vst.sshfl [vmem:[%s240_s26] sm:$0x33 pattern:$0x76325410] %v1210_v37 }
 0x1e3   : > { %1499 = shalt.err (!%p1496_p10)
}
 0x1e4   : > { %s1500_s23 = scalar_lea.hbm %s1233_s7, 64  ;;  %s1504_s12 = scalar_lea.hbm %s2229_s5, 128 }
 0x1e5   : > { %p1501_p2 = scmp.ne.s32.totalorder %s1233_s7, %s1500_s23  ;;  %p1505_p7 = scmp.lt.s32.totalorder %s1233_s7, %s2229_s5 }
 0x1e6   : > { %p1506_p0 = scmp.lt.s32.totalorder %s1504_s12, %s1500_s23 }
 0x1e7   : > { %p1502_p4 = pnand %p1501_p2, %p2248_p12 }
 0x1e8   : > { %p1507_p6 = por %p1506_p0, %p1505_p7 }
 0x1e9   : > { %p1503_p9 = pneg %p1502_p4 }
 0x1eb   : > { %p1508_p11 = pnand %p1507_p6, %p1503_p9 }
 0x1ed   : > { %1511 = shalt.err (!%p1508_p11)
}
 0x1ee   : > { %1324 = dma.vmem_to_hbm [thread:$0]  (%p2248_p12), %s1236_s29, 64, %s1233_s7, %s1221_s9  }
 0x1ef PF: > { %s1247_s16 = sand.u32 1, %s1538_s18   ;;  %p2249_p13 = scmp.ne.s32.totalorder %s2235_s6, 0 }
 0x1f0   : > { %p2250_p1 = scmp.ge.s32.totalorder %s1550_s21, 2  ;;  %s1248_s26 = scalar_lea.sflag [#allocation4], %s1247_s16 }
 0x1f2   : > { %p1331_p3 = pnand %p2250_p1, %p2249_p13 }
 0x1f4   : > { %p1332_p5 = pneg %p1331_p3 }
 0x1f6   : > { %1533 = dma.done.wait (%p1332_p5), %s1248_s26, 64  }
 0x1f7   : > { %1535 = vsyncadd (%p1332_p5), %s1248_s26, 4294967232  ;;  %p18_p8 = scmp.ge.s32.totalorder %s1654_s24, 4   ;;  %s2251_s18 = smov %s1542_s19 }
 0x1f8   : > { %s2252_s19 = smov %s1546_s20  ;;  %s2253_s20 = smov %s1666_s27 }
 0x1f9   : > { %s2254_s21 = smov %s1654_s24  ;;  %20 = sbr.rel (!%p18_p8) target bundleno = 5 (0x5), region = 85 }
 0x1fe   :  { %1253 = vsyncpa [#allocation3], 1 }
 0x1ff   :  { %1255 = vsyncpa [#allocation3 + $0x1], 1 }
 0x200   :  { %1256 = vsyncpa [#allocation4], 1 }
 0x201   :  { %1258 = vsyncpa [#allocation4 + $0x1], 1 }

</bundles_post_ra>
